<compile_context>
chip_gen: v7x
topology: tpu7x:2x2x1
jax: 0.10.0
libtpu: 0.0.40
codegen_flags: <defaults>
</compile_context>

<pallas_src>
import jax
import jax.numpy as jnp
from jax.experimental import pallas as pl
from jax.experimental.pallas import tpu as pltpu

# Small, forward-consistent dimensions.
VOCAB = 100
EMBED = 32       # embedding_dim
HIDDEN = 32      # hidden_size
SEQ = 8          # sequence length
BATCH = 2
NUM_LABELS = 2
FC1 = 256


def textrcnn_kernel(xe_ref,                         # (T*B, E) embedded tokens, time-major flat
                    wih_f_ref, whh_f_ref, b_f_ref,  # fwd LSTM:  (E,4H),(H,4H),(1,4H)
                    wih_b_ref, whh_b_ref, b_b_ref,  # bwd LSTM:  (E,4H),(H,4H),(1,4H)
                    w1x_ref, w1hf_ref, w1hb_ref,    # W1 split:  (E,256),(H,256),(H,256)
                    b1_ref,                         # (1, 256)
                    w2_ref, b2_ref,                 # (256, L), (1, L)
                    out_ref,                        # (B, L)
                    hf_ref, hb_ref):                # scratch (T*B, H) fwd/bwd hidden states
    TB, E = xe_ref.shape
    B = out_ref.shape[0]
    T = TB // B
    H = whh_f_ref.shape[0]

    xe = xe_ref[...]                                              # (T*B, E)

    # ---- hoisted input projections (off the recurrent critical path) ----
    Xf = jnp.dot(xe, wih_f_ref[...],
                 preferred_element_type=jnp.float32) + b_f_ref[...]   # (T*B, 4H)
    Xb = jnp.dot(xe, wih_b_ref[...],
                 preferred_element_type=jnp.float32) + b_b_ref[...]   # (T*B, 4H)

    def lstm_step(x_proj, h, c, whh_ref):
        # gates: (B, 4H); only the recurrent matmul is on the serial chain.
        gates = x_proj + jnp.dot(h, whh_ref[...],
                                 preferred_element_type=jnp.float32)
        sig = jax.nn.sigmoid(gates)                               # one full-width EUP pass
        i = sig[:, 0:H]
        f = sig[:, H:2 * H]
        o = sig[:, 3 * H:4 * H]
        g = jnp.tanh(gates[:, 2 * H:3 * H])
        c_new = f * c + i * g
        h_new = o * jnp.tanh(c_new)
        return h_new, c_new

    zeros = jnp.zeros((B, H), jnp.float32)

    # ---- forward-direction LSTM: fully unrolled, static slices ----
    h, c = zeros, zeros
    for t in range(T):
        h, c = lstm_step(Xf[t * B:(t + 1) * B, :], h, c, whh_f_ref)
        hf_ref[t * B:(t + 1) * B, :] = h

    # ---- backward-direction LSTM: fully unrolled, static slices ----
    h, c = zeros, zeros
    for k in range(T):
        t = T - 1 - k
        h, c = lstm_step(Xb[t * B:(t + 1) * B, :], h, c, whh_b_ref)
        hb_ref[t * B:(t + 1) * B, :] = h

    # ---- batched FC1 over all T*B rows; W1 split avoids the lane concat ----
    z = (jnp.dot(xe, w1x_ref[...], preferred_element_type=jnp.float32)
         + jnp.dot(hf_ref[...], w1hf_ref[...], preferred_element_type=jnp.float32)
         + jnp.dot(hb_ref[...], w1hb_ref[...], preferred_element_type=jnp.float32)
         + b1_ref[...])                                           # (T*B, 256)
    z = jnp.maximum(z, 0.0)                                       # ReLU

    # ---- global max pool over T (ReLU output >= 0; seed with t=0 slice) ----
    pooled = z[0:B, :]
    for t in range(1, T):
        pooled = jnp.maximum(pooled, z[t * B:(t + 1) * B, :])     # (B, 256)

    # ---- classifier head (dropout is identity in eval mode) ----
    out_ref[...] = jnp.dot(pooled, w2_ref[...],
                           preferred_element_type=jnp.float32) + b2_ref[...]


def textrcnn_forward(token_ids, p):
    B, T = token_ids.shape
    # Gather directly in time-major order (avoids transposing the embedded tensor),
    # then flatten (T, B, E) -> (T*B, E) so the kernel works on a lane-dense slab.
    xe = p["embedding"][token_ids.T]               # (T, B, E)
    xe_flat = xe.reshape(T * B, EMBED)

    # Split W1 into row blocks matching the cat order [embed | h_fwd | h_bwd].
    w1 = p["w1"]
    w1x = w1[:EMBED]
    w1hf = w1[EMBED:EMBED + HIDDEN]
    w1hb = w1[EMBED + HIDDEN:]

    return pl.pallas_call(
        textrcnn_kernel,
        out_shape=jax.ShapeDtypeStruct((B, NUM_LABELS), jnp.float32),
        in_specs=[pl.BlockSpec(memory_space=pltpu.MemorySpace.VMEM)] * 13,
        out_specs=pl.BlockSpec(memory_space=pltpu.MemorySpace.VMEM),
        scratch_shapes=[pltpu.VMEM((T * B, HIDDEN), jnp.float32),
                        pltpu.VMEM((T * B, HIDDEN), jnp.float32)],
    )(xe_flat,
      p["wih_f"], p["whh_f"], p["b_f"],
      p["wih_b"], p["whh_b"], p["b_b"],
      w1x, w1hf, w1hb, p["b1"],
      p["w2"], p["b2"])


def init_params(key):
    ks = jax.random.split(key, 11)
    s = 0.1
    f32 = jnp.float32
    return {
        "embedding": jax.random.normal(ks[0], (VOCAB, EMBED), f32) * s,
        # LSTM weights stored pre-transposed as (in, 4H); gate order i,f,g,o.
        # b = b_ih + b_hh folded into one bias per direction.
        "wih_f": jax.random.normal(ks[1], (EMBED, 4 * HIDDEN), f32) * s,
        "whh_f": jax.random.normal(ks[2], (HIDDEN, 4 * HIDDEN), f32) * s,
        "b_f":   jax.random.normal(ks[3], (1, 4 * HIDDEN), f32) * s,
        "wih_b": jax.random.normal(ks[4], (EMBED, 4 * HIDDEN), f32) * s,
        "whh_b": jax.random.normal(ks[5], (HIDDEN, 4 * HIDDEN), f32) * s,
        "b_b":   jax.random.normal(ks[6], (1, 4 * HIDDEN), f32) * s,
        "w1":    jax.random.normal(ks[7], (EMBED + 2 * HIDDEN, FC1), f32) * s,
        "b1":    jax.random.normal(ks[8], (1, FC1), f32) * s,
        "w2":    jax.random.normal(ks[9], (FC1, NUM_LABELS), f32) * s,
        "b2":    jax.random.normal(ks[10], (1, NUM_LABELS), f32) * s,
    }


def reference_forward(token_ids, p):
    """Pure-JAX reference mirroring the PyTorch forward (eval mode)."""
    emb = p["embedding"][token_ids]                # (B, T, E)
    B, T, _ = emb.shape
    H = HIDDEN

    def run_lstm(wih, whh, b, reverse):
        h = jnp.zeros((B, H), jnp.float32)
        c = jnp.zeros((B, H), jnp.float32)
        outs = [None] * T
        order = range(T - 1, -1, -1) if reverse else range(T)
        for t in order:
            x_t = emb[:, t, :]
            gates = x_t @ wih + h @ whh + b
            i = jax.nn.sigmoid(gates[:, 0:H])
            f = jax.nn.sigmoid(gates[:, H:2 * H])
            g = jnp.tanh(gates[:, 2 * H:3 * H])
            o = jax.nn.sigmoid(gates[:, 3 * H:4 * H])
            c = f * c + i * g
            h = o * jnp.tanh(c)
            outs[t] = h
        return jnp.stack(outs, axis=1)             # (B, T, H)

    hf = run_lstm(p["wih_f"], p["whh_f"], p["b_f"], reverse=False)
    hb = run_lstm(p["wih_b"], p["whh_b"], p["b_b"], reverse=True)
    feat = jnp.concatenate([emb, hf, hb], axis=-1)               # (B, T, E+2H)
    z = jnp.maximum(feat @ p["w1"] + p["b1"], 0.0)               # (B, T, 256)
    pooled = jnp.max(z, axis=1)                                  # global max pool over T
    return pooled @ p["w2"] + p["b2"]                            # (B, NUM_LABELS)


if __name__ == "__main__":
    key = jax.random.PRNGKey(0)
    pkey, xkey = jax.random.split(key)
    params = init_params(pkey)
    token_ids = jax.random.randint(xkey, (BATCH, SEQ), 0, VOCAB, dtype=jnp.int32)

    out = textrcnn_forward(token_ids, params)
    jax.block_until_ready(out)

    ref = reference_forward(token_ids, params)
    assert out.shape == (BATCH, NUM_LABELS), out.shape
    assert jnp.allclose(out, ref, atol=1e-3, rtol=1e-3), (out, ref)
    print("KERNEL_OK")
</pallas_src>

<mosaic_0001>
module attributes {stable_mosaic.version = 11 : i64} {
  func.func @textrcnn_kernel(%arg0: memref<16x32xf32, #tpu.memory_space<vmem>>, %arg1: memref<32x128xf32, #tpu.memory_space<vmem>>, %arg2: memref<32x128xf32, #tpu.memory_space<vmem>>, %arg3: memref<1x128xf32, #tpu.memory_space<vmem>>, %arg4: memref<32x128xf32, #tpu.memory_space<vmem>>, %arg5: memref<32x128xf32, #tpu.memory_space<vmem>>, %arg6: memref<1x128xf32, #tpu.memory_space<vmem>>, %arg7: memref<32x256xf32, #tpu.memory_space<vmem>>, %arg8: memref<32x256xf32, #tpu.memory_space<vmem>>, %arg9: memref<32x256xf32, #tpu.memory_space<vmem>>, %arg10: memref<1x256xf32, #tpu.memory_space<vmem>>, %arg11: memref<256x2xf32, #tpu.memory_space<vmem>>, %arg12: memref<1x2xf32, #tpu.memory_space<vmem>>, %arg13: memref<2x2xf32, #tpu.memory_space<vmem>>, %arg14: memref<16x32xf32, #tpu.memory_space<vmem>>, %arg15: memref<16x32xf32, #tpu.memory_space<vmem>>) attributes {dimension_semantics = [], scalar_prefetch = 0 : i64, scratch_operands = 2 : i64, tpu.core_type = #tpu.core_type<tc>} {
    %c0 = arith.constant 0 : index
    %c0_0 = arith.constant 0 : index
    %0 = vector.load %arg0[%c0, %c0_0] : memref<16x32xf32, #tpu.memory_space<vmem>>, vector<16x32xf32>
    %c0_1 = arith.constant 0 : index
    %c0_2 = arith.constant 0 : index
    %1 = vector.load %arg1[%c0_1, %c0_2] : memref<32x128xf32, #tpu.memory_space<vmem>>, vector<32x128xf32>
    %cst = arith.constant dense<0.000000e+00> : vector<16x128xf32>
    %2 = tpu.matmul %0, %1, %cst {dimension_numbers = #tpu.dot_dimension_numbers<[1], [0], [0], [1], [0, 0, 1, 1], [], []>} : vector<16x32xf32>, vector<32x128xf32>, vector<16x128xf32> -> vector<16x128xf32>
    %c0_3 = arith.constant 0 : index
    %c0_4 = arith.constant 0 : index
    %3 = vector.load %arg3[%c0_3, %c0_4] : memref<1x128xf32, #tpu.memory_space<vmem>>, vector<1x128xf32>
    %4 = vector.broadcast %3 : vector<1x128xf32> to vector<16x128xf32>
    %5 = arith.addf %2, %4 : vector<16x128xf32>
    %c0_5 = arith.constant 0 : index
    %c0_6 = arith.constant 0 : index
    %6 = vector.load %arg4[%c0_5, %c0_6] : memref<32x128xf32, #tpu.memory_space<vmem>>, vector<32x128xf32>
    %cst_7 = arith.constant dense<0.000000e+00> : vector<16x128xf32>
    %7 = tpu.matmul %0, %6, %cst_7 {dimension_numbers = #tpu.dot_dimension_numbers<[1], [0], [0], [1], [0, 0, 1, 1], [], []>} : vector<16x32xf32>, vector<32x128xf32>, vector<16x128xf32> -> vector<16x128xf32>
    %c0_8 = arith.constant 0 : index
    %c0_9 = arith.constant 0 : index
    %8 = vector.load %arg6[%c0_8, %c0_9] : memref<1x128xf32, #tpu.memory_space<vmem>>, vector<1x128xf32>
    %9 = vector.broadcast %8 : vector<1x128xf32> to vector<16x128xf32>
    %10 = arith.addf %7, %9 : vector<16x128xf32>
    %cst_10 = arith.constant 0.000000e+00 : f32
    %11 = vector.broadcast %cst_10 : f32 to vector<2x32xf32>
    %12 = vector.extract_strided_slice %5 {offsets = [0, 0], sizes = [2, 128], strides = [1, 1]} : vector<16x128xf32> to vector<2x128xf32>
    %c0_11 = arith.constant 0 : index
    %c0_12 = arith.constant 0 : index
    %13 = vector.load %arg2[%c0_11, %c0_12] : memref<32x128xf32, #tpu.memory_space<vmem>>, vector<32x128xf32>
    %cst_13 = arith.constant dense<0.000000e+00> : vector<2x128xf32>
    %14 = tpu.matmul %11, %13, %cst_13 {dimension_numbers = #tpu.dot_dimension_numbers<[1], [0], [0], [1], [0, 0, 1, 1], [], []>} : vector<2x32xf32>, vector<32x128xf32>, vector<2x128xf32> -> vector<2x128xf32>
    %15 = arith.addf %12, %14 : vector<2x128xf32>
    %16 = arith.negf %15 : vector<2x128xf32>
    %17 = math.exp %16 : vector<2x128xf32>
    %cst_14 = arith.constant 1.000000e+00 : f32
    %18 = vector.broadcast %cst_14 : f32 to vector<2x128xf32>
    %19 = arith.addf %18, %17 : vector<2x128xf32>
    %20 = arith.divf %18, %19 : vector<2x128xf32>
    %21 = vector.extract_strided_slice %20 {offsets = [0, 0], sizes = [2, 32], strides = [1, 1]} : vector<2x128xf32> to vector<2x32xf32>
    %22 = vector.extract_strided_slice %20 {offsets = [0, 32], sizes = [2, 32], strides = [1, 1]} : vector<2x128xf32> to vector<2x32xf32>
    %23 = vector.extract_strided_slice %20 {offsets = [0, 96], sizes = [2, 32], strides = [1, 1]} : vector<2x128xf32> to vector<2x32xf32>
    %24 = vector.extract_strided_slice %15 {offsets = [0, 64], sizes = [2, 32], strides = [1, 1]} : vector<2x128xf32> to vector<2x32xf32>
    %25 = math.tanh %24 : vector<2x32xf32>
    %26 = arith.mulf %22, %11 : vector<2x32xf32>
    %27 = arith.mulf %21, %25 : vector<2x32xf32>
    %28 = arith.addf %26, %27 : vector<2x32xf32>
    %29 = math.tanh %28 : vector<2x32xf32>
    %30 = arith.mulf %23, %29 : vector<2x32xf32>
    %c0_15 = arith.constant 0 : index
    %c0_16 = arith.constant 0 : index
    %31 = vector.load %arg14[%c0_15, %c0_16] : memref<16x32xf32, #tpu.memory_space<vmem>>, vector<2x32xf32>
    tpu.vector_store %arg14[%c0_15, %c0_16], %30 {strides = array<i32>} : memref<16x32xf32, #tpu.memory_space<vmem>>, vector<2x32xf32>,
    %32 = vector.extract_strided_slice %5 {offsets = [2, 0], sizes = [2, 128], strides = [1, 1]} : vector<16x128xf32> to vector<2x128xf32>
    %c0_17 = arith.constant 0 : index
    %c0_18 = arith.constant 0 : index
    %33 = vector.load %arg2[%c0_17, %c0_18] : memref<32x128xf32, #tpu.memory_space<vmem>>, vector<32x128xf32>
    %cst_19 = arith.constant dense<0.000000e+00> : vector<2x128xf32>
    %34 = tpu.matmul %30, %33, %cst_19 {dimension_numbers = #tpu.dot_dimension_numbers<[1], [0], [0], [1], [0, 0, 1, 1], [], []>} : vector<2x32xf32>, vector<32x128xf32>, vector<2x128xf32> -> vector<2x128xf32>
    %35 = arith.addf %32, %34 : vector<2x128xf32>
    %36 = arith.negf %35 : vector<2x128xf32>
    %37 = math.exp %36 : vector<2x128xf32>
    %cst_20 = arith.constant 1.000000e+00 : f32
    %38 = vector.broadcast %cst_20 : f32 to vector<2x128xf32>
    %39 = arith.addf %38, %37 : vector<2x128xf32>
    %40 = arith.divf %38, %39 : vector<2x128xf32>
    %41 = vector.extract_strided_slice %40 {offsets = [0, 0], sizes = [2, 32], strides = [1, 1]} : vector<2x128xf32> to vector<2x32xf32>
    %42 = vector.extract_strided_slice %40 {offsets = [0, 32], sizes = [2, 32], strides = [1, 1]} : vector<2x128xf32> to vector<2x32xf32>
    %43 = vector.extract_strided_slice %40 {offsets = [0, 96], sizes = [2, 32], strides = [1, 1]} : vector<2x128xf32> to vector<2x32xf32>
    %44 = vector.extract_strided_slice %35 {offsets = [0, 64], sizes = [2, 32], strides = [1, 1]} : vector<2x128xf32> to vector<2x32xf32>
    %45 = math.tanh %44 : vector<2x32xf32>
    %46 = arith.mulf %42, %28 : vector<2x32xf32>
    %47 = arith.mulf %41, %45 : vector<2x32xf32>
    %48 = arith.addf %46, %47 : vector<2x32xf32>
    %49 = math.tanh %48 : vector<2x32xf32>
    %50 = arith.mulf %43, %49 : vector<2x32xf32>
    %c2 = arith.constant 2 : index
    %c0_21 = arith.constant 0 : index
    %51 = vector.load %arg14[%c2, %c0_21] : memref<16x32xf32, #tpu.memory_space<vmem>>, vector<2x32xf32>
    tpu.vector_store %arg14[%c2, %c0_21], %50 {strides = array<i32>} : memref<16x32xf32, #tpu.memory_space<vmem>>, vector<2x32xf32>,
    %52 = vector.extract_strided_slice %5 {offsets = [4, 0], sizes = [2, 128], strides = [1, 1]} : vector<16x128xf32> to vector<2x128xf32>
    %c0_22 = arith.constant 0 : index
    %c0_23 = arith.constant 0 : index
    %53 = vector.load %arg2[%c0_22, %c0_23] : memref<32x128xf32, #tpu.memory_space<vmem>>, vector<32x128xf32>
    %cst_24 = arith.constant dense<0.000000e+00> : vector<2x128xf32>
    %54 = tpu.matmul %50, %53, %cst_24 {dimension_numbers = #tpu.dot_dimension_numbers<[1], [0], [0], [1], [0, 0, 1, 1], [], []>} : vector<2x32xf32>, vector<32x128xf32>, vector<2x128xf32> -> vector<2x128xf32>
    %55 = arith.addf %52, %54 : vector<2x128xf32>
    %56 = arith.negf %55 : vector<2x128xf32>
    %57 = math.exp %56 : vector<2x128xf32>
    %cst_25 = arith.constant 1.000000e+00 : f32
    %58 = vector.broadcast %cst_25 : f32 to vector<2x128xf32>
    %59 = arith.addf %58, %57 : vector<2x128xf32>
    %60 = arith.divf %58, %59 : vector<2x128xf32>
    %61 = vector.extract_strided_slice %60 {offsets = [0, 0], sizes = [2, 32], strides = [1, 1]} : vector<2x128xf32> to vector<2x32xf32>
    %62 = vector.extract_strided_slice %60 {offsets = [0, 32], sizes = [2, 32], strides = [1, 1]} : vector<2x128xf32> to vector<2x32xf32>
    %63 = vector.extract_strided_slice %60 {offsets = [0, 96], sizes = [2, 32], strides = [1, 1]} : vector<2x128xf32> to vector<2x32xf32>
    %64 = vector.extract_strided_slice %55 {offsets = [0, 64], sizes = [2, 32], strides = [1, 1]} : vector<2x128xf32> to vector<2x32xf32>
    %65 = math.tanh %64 : vector<2x32xf32>
    %66 = arith.mulf %62, %48 : vector<2x32xf32>
    %67 = arith.mulf %61, %65 : vector<2x32xf32>
    %68 = arith.addf %66, %67 : vector<2x32xf32>
    %69 = math.tanh %68 : vector<2x32xf32>
    %70 = arith.mulf %63, %69 : vector<2x32xf32>
    %c4 = arith.constant 4 : index
    %c0_26 = arith.constant 0 : index
    %71 = vector.load %arg14[%c4, %c0_26] : memref<16x32xf32, #tpu.memory_space<vmem>>, vector<2x32xf32>
    tpu.vector_store %arg14[%c4, %c0_26], %70 {strides = array<i32>} : memref<16x32xf32, #tpu.memory_space<vmem>>, vector<2x32xf32>,
    %72 = vector.extract_strided_slice %5 {offsets = [6, 0], sizes = [2, 128], strides = [1, 1]} : vector<16x128xf32> to vector<2x128xf32>
    %c0_27 = arith.constant 0 : index
    %c0_28 = arith.constant 0 : index
    %73 = vector.load %arg2[%c0_27, %c0_28] : memref<32x128xf32, #tpu.memory_space<vmem>>, vector<32x128xf32>
    %cst_29 = arith.constant dense<0.000000e+00> : vector<2x128xf32>
    %74 = tpu.matmul %70, %73, %cst_29 {dimension_numbers = #tpu.dot_dimension_numbers<[1], [0], [0], [1], [0, 0, 1, 1], [], []>} : vector<2x32xf32>, vector<32x128xf32>, vector<2x128xf32> -> vector<2x128xf32>
    %75 = arith.addf %72, %74 : vector<2x128xf32>
    %76 = arith.negf %75 : vector<2x128xf32>
    %77 = math.exp %76 : vector<2x128xf32>
    %cst_30 = arith.constant 1.000000e+00 : f32
    %78 = vector.broadcast %cst_30 : f32 to vector<2x128xf32>
    %79 = arith.addf %78, %77 : vector<2x128xf32>
    %80 = arith.divf %78, %79 : vector<2x128xf32>
    %81 = vector.extract_strided_slice %80 {offsets = [0, 0], sizes = [2, 32], strides = [1, 1]} : vector<2x128xf32> to vector<2x32xf32>
    %82 = vector.extract_strided_slice %80 {offsets = [0, 32], sizes = [2, 32], strides = [1, 1]} : vector<2x128xf32> to vector<2x32xf32>
    %83 = vector.extract_strided_slice %80 {offsets = [0, 96], sizes = [2, 32], strides = [1, 1]} : vector<2x128xf32> to vector<2x32xf32>
    %84 = vector.extract_strided_slice %75 {offsets = [0, 64], sizes = [2, 32], strides = [1, 1]} : vector<2x128xf32> to vector<2x32xf32>
    %85 = math.tanh %84 : vector<2x32xf32>
    %86 = arith.mulf %82, %68 : vector<2x32xf32>
    %87 = arith.mulf %81, %85 : vector<2x32xf32>
    %88 = arith.addf %86, %87 : vector<2x32xf32>
    %89 = math.tanh %88 : vector<2x32xf32>
    %90 = arith.mulf %83, %89 : vector<2x32xf32>
    %c6 = arith.constant 6 : index
    %c0_31 = arith.constant 0 : index
    %91 = vector.load %arg14[%c6, %c0_31] : memref<16x32xf32, #tpu.memory_space<vmem>>, vector<2x32xf32>
    tpu.vector_store %arg14[%c6, %c0_31], %90 {strides = array<i32>} : memref<16x32xf32, #tpu.memory_space<vmem>>, vector<2x32xf32>,
    %92 = vector.extract_strided_slice %5 {offsets = [8, 0], sizes = [2, 128], strides = [1, 1]} : vector<16x128xf32> to vector<2x128xf32>
    %c0_32 = arith.constant 0 : index
    %c0_33 = arith.constant 0 : index
    %93 = vector.load %arg2[%c0_32, %c0_33] : memref<32x128xf32, #tpu.memory_space<vmem>>, vector<32x128xf32>
    %cst_34 = arith.constant dense<0.000000e+00> : vector<2x128xf32>
    %94 = tpu.matmul %90, %93, %cst_34 {dimension_numbers = #tpu.dot_dimension_numbers<[1], [0], [0], [1], [0, 0, 1, 1], [], []>} : vector<2x32xf32>, vector<32x128xf32>, vector<2x128xf32> -> vector<2x128xf32>
    %95 = arith.addf %92, %94 : vector<2x128xf32>
    %96 = arith.negf %95 : vector<2x128xf32>
    %97 = math.exp %96 : vector<2x128xf32>
    %cst_35 = arith.constant 1.000000e+00 : f32
    %98 = vector.broadcast %cst_35 : f32 to vector<2x128xf32>
    %99 = arith.addf %98, %97 : vector<2x128xf32>
    %100 = arith.divf %98, %99 : vector<2x128xf32>
    %101 = vector.extract_strided_slice %100 {offsets = [0, 0], sizes = [2, 32], strides = [1, 1]} : vector<2x128xf32> to vector<2x32xf32>
    %102 = vector.extract_strided_slice %100 {offsets = [0, 32], sizes = [2, 32], strides = [1, 1]} : vector<2x128xf32> to vector<2x32xf32>
    %103 = vector.extract_strided_slice %100 {offsets = [0, 96], sizes = [2, 32], strides = [1, 1]} : vector<2x128xf32> to vector<2x32xf32>
    %104 = vector.extract_strided_slice %95 {offsets = [0, 64], sizes = [2, 32], strides = [1, 1]} : vector<2x128xf32> to vector<2x32xf32>
    %105 = math.tanh %104 : vector<2x32xf32>
    %106 = arith.mulf %102, %88 : vector<2x32xf32>
    %107 = arith.mulf %101, %105 : vector<2x32xf32>
    %108 = arith.addf %106, %107 : vector<2x32xf32>
    %109 = math.tanh %108 : vector<2x32xf32>
    %110 = arith.mulf %103, %109 : vector<2x32xf32>
    %c8 = arith.constant 8 : index
    %c0_36 = arith.constant 0 : index
    %111 = vector.load %arg14[%c8, %c0_36] : memref<16x32xf32, #tpu.memory_space<vmem>>, vector<2x32xf32>
    tpu.vector_store %arg14[%c8, %c0_36], %110 {strides = array<i32>} : memref<16x32xf32, #tpu.memory_space<vmem>>, vector<2x32xf32>,
    %112 = vector.extract_strided_slice %5 {offsets = [10, 0], sizes = [2, 128], strides = [1, 1]} : vector<16x128xf32> to vector<2x128xf32>
    %c0_37 = arith.constant 0 : index
    %c0_38 = arith.constant 0 : index
    %113 = vector.load %arg2[%c0_37, %c0_38] : memref<32x128xf32, #tpu.memory_space<vmem>>, vector<32x128xf32>
    %cst_39 = arith.constant dense<0.000000e+00> : vector<2x128xf32>
    %114 = tpu.matmul %110, %113, %cst_39 {dimension_numbers = #tpu.dot_dimension_numbers<[1], [0], [0], [1], [0, 0, 1, 1], [], []>} : vector<2x32xf32>, vector<32x128xf32>, vector<2x128xf32> -> vector<2x128xf32>
    %115 = arith.addf %112, %114 : vector<2x128xf32>
    %116 = arith.negf %115 : vector<2x128xf32>
    %117 = math.exp %116 : vector<2x128xf32>
    %cst_40 = arith.constant 1.000000e+00 : f32
    %118 = vector.broadcast %cst_40 : f32 to vector<2x128xf32>
    %119 = arith.addf %118, %117 : vector<2x128xf32>
    %120 = arith.divf %118, %119 : vector<2x128xf32>
    %121 = vector.extract_strided_slice %120 {offsets = [0, 0], sizes = [2, 32], strides = [1, 1]} : vector<2x128xf32> to vector<2x32xf32>
    %122 = vector.extract_strided_slice %120 {offsets = [0, 32], sizes = [2, 32], strides = [1, 1]} : vector<2x128xf32> to vector<2x32xf32>
    %123 = vector.extract_strided_slice %120 {offsets = [0, 96], sizes = [2, 32], strides = [1, 1]} : vector<2x128xf32> to vector<2x32xf32>
    %124 = vector.extract_strided_slice %115 {offsets = [0, 64], sizes = [2, 32], strides = [1, 1]} : vector<2x128xf32> to vector<2x32xf32>
    %125 = math.tanh %124 : vector<2x32xf32>
    %126 = arith.mulf %122, %108 : vector<2x32xf32>
    %127 = arith.mulf %121, %125 : vector<2x32xf32>
    %128 = arith.addf %126, %127 : vector<2x32xf32>
    %129 = math.tanh %128 : vector<2x32xf32>
    %130 = arith.mulf %123, %129 : vector<2x32xf32>
    %c10 = arith.constant 10 : index
    %c0_41 = arith.constant 0 : index
    %131 = vector.load %arg14[%c10, %c0_41] : memref<16x32xf32, #tpu.memory_space<vmem>>, vector<2x32xf32>
    tpu.vector_store %arg14[%c10, %c0_41], %130 {strides = array<i32>} : memref<16x32xf32, #tpu.memory_space<vmem>>, vector<2x32xf32>,
    %132 = vector.extract_strided_slice %5 {offsets = [12, 0], sizes = [2, 128], strides = [1, 1]} : vector<16x128xf32> to vector<2x128xf32>
    %c0_42 = arith.constant 0 : index
    %c0_43 = arith.constant 0 : index
    %133 = vector.load %arg2[%c0_42, %c0_43] : memref<32x128xf32, #tpu.memory_space<vmem>>, vector<32x128xf32>
    %cst_44 = arith.constant dense<0.000000e+00> : vector<2x128xf32>
    %134 = tpu.matmul %130, %133, %cst_44 {dimension_numbers = #tpu.dot_dimension_numbers<[1], [0], [0], [1], [0, 0, 1, 1], [], []>} : vector<2x32xf32>, vector<32x128xf32>, vector<2x128xf32> -> vector<2x128xf32>
    %135 = arith.addf %132, %134 : vector<2x128xf32>
    %136 = arith.negf %135 : vector<2x128xf32>
    %137 = math.exp %136 : vector<2x128xf32>
    %cst_45 = arith.constant 1.000000e+00 : f32
    %138 = vector.broadcast %cst_45 : f32 to vector<2x128xf32>
    %139 = arith.addf %138, %137 : vector<2x128xf32>
    %140 = arith.divf %138, %139 : vector<2x128xf32>
    %141 = vector.extract_strided_slice %140 {offsets = [0, 0], sizes = [2, 32], strides = [1, 1]} : vector<2x128xf32> to vector<2x32xf32>
    %142 = vector.extract_strided_slice %140 {offsets = [0, 32], sizes = [2, 32], strides = [1, 1]} : vector<2x128xf32> to vector<2x32xf32>
    %143 = vector.extract_strided_slice %140 {offsets = [0, 96], sizes = [2, 32], strides = [1, 1]} : vector<2x128xf32> to vector<2x32xf32>
    %144 = vector.extract_strided_slice %135 {offsets = [0, 64], sizes = [2, 32], strides = [1, 1]} : vector<2x128xf32> to vector<2x32xf32>
    %145 = math.tanh %144 : vector<2x32xf32>
    %146 = arith.mulf %142, %128 : vector<2x32xf32>
    %147 = arith.mulf %141, %145 : vector<2x32xf32>
    %148 = arith.addf %146, %147 : vector<2x32xf32>
    %149 = math.tanh %148 : vector<2x32xf32>
    %150 = arith.mulf %143, %149 : vector<2x32xf32>
    %c12 = arith.constant 12 : index
    %c0_46 = arith.constant 0 : index
    %151 = vector.load %arg14[%c12, %c0_46] : memref<16x32xf32, #tpu.memory_space<vmem>>, vector<2x32xf32>
    tpu.vector_store %arg14[%c12, %c0_46], %150 {strides = array<i32>} : memref<16x32xf32, #tpu.memory_space<vmem>>, vector<2x32xf32>,
    %152 = vector.extract_strided_slice %5 {offsets = [14, 0], sizes = [2, 128], strides = [1, 1]} : vector<16x128xf32> to vector<2x128xf32>
    %c0_47 = arith.constant 0 : index
    %c0_48 = arith.constant 0 : index
    %153 = vector.load %arg2[%c0_47, %c0_48] : memref<32x128xf32, #tpu.memory_space<vmem>>, vector<32x128xf32>
    %cst_49 = arith.constant dense<0.000000e+00> : vector<2x128xf32>
    %154 = tpu.matmul %150, %153, %cst_49 {dimension_numbers = #tpu.dot_dimension_numbers<[1], [0], [0], [1], [0, 0, 1, 1], [], []>} : vector<2x32xf32>, vector<32x128xf32>, vector<2x128xf32> -> vector<2x128xf32>
    %155 = arith.addf %152, %154 : vector<2x128xf32>
    %156 = arith.negf %155 : vector<2x128xf32>
    %157 = math.exp %156 : vector<2x128xf32>
    %cst_50 = arith.constant 1.000000e+00 : f32
    %158 = vector.broadcast %cst_50 : f32 to vector<2x128xf32>
    %159 = arith.addf %158, %157 : vector<2x128xf32>
    %160 = arith.divf %158, %159 : vector<2x128xf32>
    %161 = vector.extract_strided_slice %160 {offsets = [0, 0], sizes = [2, 32], strides = [1, 1]} : vector<2x128xf32> to vector<2x32xf32>
    %162 = vector.extract_strided_slice %160 {offsets = [0, 32], sizes = [2, 32], strides = [1, 1]} : vector<2x128xf32> to vector<2x32xf32>
    %163 = vector.extract_strided_slice %160 {offsets = [0, 96], sizes = [2, 32], strides = [1, 1]} : vector<2x128xf32> to vector<2x32xf32>
    %164 = vector.extract_strided_slice %155 {offsets = [0, 64], sizes = [2, 32], strides = [1, 1]} : vector<2x128xf32> to vector<2x32xf32>
    %165 = math.tanh %164 : vector<2x32xf32>
    %166 = arith.mulf %162, %148 : vector<2x32xf32>
    %167 = arith.mulf %161, %165 : vector<2x32xf32>
    %168 = arith.addf %166, %167 : vector<2x32xf32>
    %169 = math.tanh %168 : vector<2x32xf32>
    %170 = arith.mulf %163, %169 : vector<2x32xf32>
    %c14 = arith.constant 14 : index
    %c0_51 = arith.constant 0 : index
    %171 = vector.load %arg14[%c14, %c0_51] : memref<16x32xf32, #tpu.memory_space<vmem>>, vector<2x32xf32>
    tpu.vector_store %arg14[%c14, %c0_51], %170 {strides = array<i32>} : memref<16x32xf32, #tpu.memory_space<vmem>>, vector<2x32xf32>,
    %172 = vector.extract_strided_slice %10 {offsets = [14, 0], sizes = [2, 128], strides = [1, 1]} : vector<16x128xf32> to vector<2x128xf32>
    %c0_52 = arith.constant 0 : index
    %c0_53 = arith.constant 0 : index
    %173 = vector.load %arg5[%c0_52, %c0_53] : memref<32x128xf32, #tpu.memory_space<vmem>>, vector<32x128xf32>
    %cst_54 = arith.constant dense<0.000000e+00> : vector<2x128xf32>
    %174 = tpu.matmul %11, %173, %cst_54 {dimension_numbers = #tpu.dot_dimension_numbers<[1], [0], [0], [1], [0, 0, 1, 1], [], []>} : vector<2x32xf32>, vector<32x128xf32>, vector<2x128xf32> -> vector<2x128xf32>
    %175 = arith.addf %172, %174 : vector<2x128xf32>
    %176 = arith.negf %175 : vector<2x128xf32>
    %177 = math.exp %176 : vector<2x128xf32>
    %cst_55 = arith.constant 1.000000e+00 : f32
    %178 = vector.broadcast %cst_55 : f32 to vector<2x128xf32>
    %179 = arith.addf %178, %177 : vector<2x128xf32>
    %180 = arith.divf %178, %179 : vector<2x128xf32>
    %181 = vector.extract_strided_slice %180 {offsets = [0, 0], sizes = [2, 32], strides = [1, 1]} : vector<2x128xf32> to vector<2x32xf32>
    %182 = vector.extract_strided_slice %180 {offsets = [0, 32], sizes = [2, 32], strides = [1, 1]} : vector<2x128xf32> to vector<2x32xf32>
    %183 = vector.extract_strided_slice %180 {offsets = [0, 96], sizes = [2, 32], strides = [1, 1]} : vector<2x128xf32> to vector<2x32xf32>
    %184 = vector.extract_strided_slice %175 {offsets = [0, 64], sizes = [2, 32], strides = [1, 1]} : vector<2x128xf32> to vector<2x32xf32>
    %185 = math.tanh %184 : vector<2x32xf32>
    %186 = arith.mulf %182, %11 : vector<2x32xf32>
    %187 = arith.mulf %181, %185 : vector<2x32xf32>
    %188 = arith.addf %186, %187 : vector<2x32xf32>
    %189 = math.tanh %188 : vector<2x32xf32>
    %190 = arith.mulf %183, %189 : vector<2x32xf32>
    %c14_56 = arith.constant 14 : index
    %c0_57 = arith.constant 0 : index
    %191 = vector.load %arg15[%c14_56, %c0_57] : memref<16x32xf32, #tpu.memory_space<vmem>>, vector<2x32xf32>
    tpu.vector_store %arg15[%c14_56, %c0_57], %190 {strides = array<i32>} : memref<16x32xf32, #tpu.memory_space<vmem>>, vector<2x32xf32>,
    %192 = vector.extract_strided_slice %10 {offsets = [12, 0], sizes = [2, 128], strides = [1, 1]} : vector<16x128xf32> to vector<2x128xf32>
    %c0_58 = arith.constant 0 : index
    %c0_59 = arith.constant 0 : index
    %193 = vector.load %arg5[%c0_58, %c0_59] : memref<32x128xf32, #tpu.memory_space<vmem>>, vector<32x128xf32>
    %cst_60 = arith.constant dense<0.000000e+00> : vector<2x128xf32>
    %194 = tpu.matmul %190, %193, %cst_60 {dimension_numbers = #tpu.dot_dimension_numbers<[1], [0], [0], [1], [0, 0, 1, 1], [], []>} : vector<2x32xf32>, vector<32x128xf32>, vector<2x128xf32> -> vector<2x128xf32>
    %195 = arith.addf %192, %194 : vector<2x128xf32>
    %196 = arith.negf %195 : vector<2x128xf32>
    %197 = math.exp %196 : vector<2x128xf32>
    %cst_61 = arith.constant 1.000000e+00 : f32
    %198 = vector.broadcast %cst_61 : f32 to vector<2x128xf32>
    %199 = arith.addf %198, %197 : vector<2x128xf32>
    %200 = arith.divf %198, %199 : vector<2x128xf32>
    %201 = vector.extract_strided_slice %200 {offsets = [0, 0], sizes = [2, 32], strides = [1, 1]} : vector<2x128xf32> to vector<2x32xf32>
    %202 = vector.extract_strided_slice %200 {offsets = [0, 32], sizes = [2, 32], strides = [1, 1]} : vector<2x128xf32> to vector<2x32xf32>
    %203 = vector.extract_strided_slice %200 {offsets = [0, 96], sizes = [2, 32], strides = [1, 1]} : vector<2x128xf32> to vector<2x32xf32>
    %204 = vector.extract_strided_slice %195 {offsets = [0, 64], sizes = [2, 32], strides = [1, 1]} : vector<2x128xf32> to vector<2x32xf32>
    %205 = math.tanh %204 : vector<2x32xf32>
    %206 = arith.mulf %202, %188 : vector<2x32xf32>
    %207 = arith.mulf %201, %205 : vector<2x32xf32>
    %208 = arith.addf %206, %207 : vector<2x32xf32>
    %209 = math.tanh %208 : vector<2x32xf32>
    %210 = arith.mulf %203, %209 : vector<2x32xf32>
    %c12_62 = arith.constant 12 : index
    %c0_63 = arith.constant 0 : index
    %211 = vector.load %arg15[%c12_62, %c0_63] : memref<16x32xf32, #tpu.memory_space<vmem>>, vector<2x32xf32>
    tpu.vector_store %arg15[%c12_62, %c0_63], %210 {strides = array<i32>} : memref<16x32xf32, #tpu.memory_space<vmem>>, vector<2x32xf32>,
    %212 = vector.extract_strided_slice %10 {offsets = [10, 0], sizes = [2, 128], strides = [1, 1]} : vector<16x128xf32> to vector<2x128xf32>
    %c0_64 = arith.constant 0 : index
    %c0_65 = arith.constant 0 : index
    %213 = vector.load %arg5[%c0_64, %c0_65] : memref<32x128xf32, #tpu.memory_space<vmem>>, vector<32x128xf32>
    %cst_66 = arith.constant dense<0.000000e+00> : vector<2x128xf32>
    %214 = tpu.matmul %210, %213, %cst_66 {dimension_numbers = #tpu.dot_dimension_numbers<[1], [0], [0], [1], [0, 0, 1, 1], [], []>} : vector<2x32xf32>, vector<32x128xf32>, vector<2x128xf32> -> vector<2x128xf32>
    %215 = arith.addf %212, %214 : vector<2x128xf32>
    %216 = arith.negf %215 : vector<2x128xf32>
    %217 = math.exp %216 : vector<2x128xf32>
    %cst_67 = arith.constant 1.000000e+00 : f32
    %218 = vector.broadcast %cst_67 : f32 to vector<2x128xf32>
    %219 = arith.addf %218, %217 : vector<2x128xf32>
    %220 = arith.divf %218, %219 : vector<2x128xf32>
    %221 = vector.extract_strided_slice %220 {offsets = [0, 0], sizes = [2, 32], strides = [1, 1]} : vector<2x128xf32> to vector<2x32xf32>
    %222 = vector.extract_strided_slice %220 {offsets = [0, 32], sizes = [2, 32], strides = [1, 1]} : vector<2x128xf32> to vector<2x32xf32>
    %223 = vector.extract_strided_slice %220 {offsets = [0, 96], sizes = [2, 32], strides = [1, 1]} : vector<2x128xf32> to vector<2x32xf32>
    %224 = vector.extract_strided_slice %215 {offsets = [0, 64], sizes = [2, 32], strides = [1, 1]} : vector<2x128xf32> to vector<2x32xf32>
    %225 = math.tanh %224 : vector<2x32xf32>
    %226 = arith.mulf %222, %208 : vector<2x32xf32>
    %227 = arith.mulf %221, %225 : vector<2x32xf32>
    %228 = arith.addf %226, %227 : vector<2x32xf32>
    %229 = math.tanh %228 : vector<2x32xf32>
    %230 = arith.mulf %223, %229 : vector<2x32xf32>
    %c10_68 = arith.constant 10 : index
    %c0_69 = arith.constant 0 : index
    %231 = vector.load %arg15[%c10_68, %c0_69] : memref<16x32xf32, #tpu.memory_space<vmem>>, vector<2x32xf32>
    tpu.vector_store %arg15[%c10_68, %c0_69], %230 {strides = array<i32>} : memref<16x32xf32, #tpu.memory_space<vmem>>, vector<2x32xf32>,
    %232 = vector.extract_strided_slice %10 {offsets = [8, 0], sizes = [2, 128], strides = [1, 1]} : vector<16x128xf32> to vector<2x128xf32>
    %c0_70 = arith.constant 0 : index
    %c0_71 = arith.constant 0 : index
    %233 = vector.load %arg5[%c0_70, %c0_71] : memref<32x128xf32, #tpu.memory_space<vmem>>, vector<32x128xf32>
    %cst_72 = arith.constant dense<0.000000e+00> : vector<2x128xf32>
    %234 = tpu.matmul %230, %233, %cst_72 {dimension_numbers = #tpu.dot_dimension_numbers<[1], [0], [0], [1], [0, 0, 1, 1], [], []>} : vector<2x32xf32>, vector<32x128xf32>, vector<2x128xf32> -> vector<2x128xf32>
    %235 = arith.addf %232, %234 : vector<2x128xf32>
    %236 = arith.negf %235 : vector<2x128xf32>
    %237 = math.exp %236 : vector<2x128xf32>
    %cst_73 = arith.constant 1.000000e+00 : f32
    %238 = vector.broadcast %cst_73 : f32 to vector<2x128xf32>
    %239 = arith.addf %238, %237 : vector<2x128xf32>
    %240 = arith.divf %238, %239 : vector<2x128xf32>
    %241 = vector.extract_strided_slice %240 {offsets = [0, 0], sizes = [2, 32], strides = [1, 1]} : vector<2x128xf32> to vector<2x32xf32>
    %242 = vector.extract_strided_slice %240 {offsets = [0, 32], sizes = [2, 32], strides = [1, 1]} : vector<2x128xf32> to vector<2x32xf32>
    %243 = vector.extract_strided_slice %240 {offsets = [0, 96], sizes = [2, 32], strides = [1, 1]} : vector<2x128xf32> to vector<2x32xf32>
    %244 = vector.extract_strided_slice %235 {offsets = [0, 64], sizes = [2, 32], strides = [1, 1]} : vector<2x128xf32> to vector<2x32xf32>
    %245 = math.tanh %244 : vector<2x32xf32>
    %246 = arith.mulf %242, %228 : vector<2x32xf32>
    %247 = arith.mulf %241, %245 : vector<2x32xf32>
    %248 = arith.addf %246, %247 : vector<2x32xf32>
    %249 = math.tanh %248 : vector<2x32xf32>
    %250 = arith.mulf %243, %249 : vector<2x32xf32>
    %c8_74 = arith.constant 8 : index
    %c0_75 = arith.constant 0 : index
    %251 = vector.load %arg15[%c8_74, %c0_75] : memref<16x32xf32, #tpu.memory_space<vmem>>, vector<2x32xf32>
    tpu.vector_store %arg15[%c8_74, %c0_75], %250 {strides = array<i32>} : memref<16x32xf32, #tpu.memory_space<vmem>>, vector<2x32xf32>,
    %252 = vector.extract_strided_slice %10 {offsets = [6, 0], sizes = [2, 128], strides = [1, 1]} : vector<16x128xf32> to vector<2x128xf32>
    %c0_76 = arith.constant 0 : index
    %c0_77 = arith.constant 0 : index
    %253 = vector.load %arg5[%c0_76, %c0_77] : memref<32x128xf32, #tpu.memory_space<vmem>>, vector<32x128xf32>
    %cst_78 = arith.constant dense<0.000000e+00> : vector<2x128xf32>
    %254 = tpu.matmul %250, %253, %cst_78 {dimension_numbers = #tpu.dot_dimension_numbers<[1], [0], [0], [1], [0, 0, 1, 1], [], []>} : vector<2x32xf32>, vector<32x128xf32>, vector<2x128xf32> -> vector<2x128xf32>
    %255 = arith.addf %252, %254 : vector<2x128xf32>
    %256 = arith.negf %255 : vector<2x128xf32>
    %257 = math.exp %256 : vector<2x128xf32>
    %cst_79 = arith.constant 1.000000e+00 : f32
    %258 = vector.broadcast %cst_79 : f32 to vector<2x128xf32>
    %259 = arith.addf %258, %257 : vector<2x128xf32>
    %260 = arith.divf %258, %259 : vector<2x128xf32>
    %261 = vector.extract_strided_slice %260 {offsets = [0, 0], sizes = [2, 32], strides = [1, 1]} : vector<2x128xf32> to vector<2x32xf32>
    %262 = vector.extract_strided_slice %260 {offsets = [0, 32], sizes = [2, 32], strides = [1, 1]} : vector<2x128xf32> to vector<2x32xf32>
    %263 = vector.extract_strided_slice %260 {offsets = [0, 96], sizes = [2, 32], strides = [1, 1]} : vector<2x128xf32> to vector<2x32xf32>
    %264 = vector.extract_strided_slice %255 {offsets = [0, 64], sizes = [2, 32], strides = [1, 1]} : vector<2x128xf32> to vector<2x32xf32>
    %265 = math.tanh %264 : vector<2x32xf32>
    %266 = arith.mulf %262, %248 : vector<2x32xf32>
    %267 = arith.mulf %261, %265 : vector<2x32xf32>
    %268 = arith.addf %266, %267 : vector<2x32xf32>
    %269 = math.tanh %268 : vector<2x32xf32>
    %270 = arith.mulf %263, %269 : vector<2x32xf32>
    %c6_80 = arith.constant 6 : index
    %c0_81 = arith.constant 0 : index
    %271 = vector.load %arg15[%c6_80, %c0_81] : memref<16x32xf32, #tpu.memory_space<vmem>>, vector<2x32xf32>
    tpu.vector_store %arg15[%c6_80, %c0_81], %270 {strides = array<i32>} : memref<16x32xf32, #tpu.memory_space<vmem>>, vector<2x32xf32>,
    %272 = vector.extract_strided_slice %10 {offsets = [4, 0], sizes = [2, 128], strides = [1, 1]} : vector<16x128xf32> to vector<2x128xf32>
    %c0_82 = arith.constant 0 : index
    %c0_83 = arith.constant 0 : index
    %273 = vector.load %arg5[%c0_82, %c0_83] : memref<32x128xf32, #tpu.memory_space<vmem>>, vector<32x128xf32>
    %cst_84 = arith.constant dense<0.000000e+00> : vector<2x128xf32>
    %274 = tpu.matmul %270, %273, %cst_84 {dimension_numbers = #tpu.dot_dimension_numbers<[1], [0], [0], [1], [0, 0, 1, 1], [], []>} : vector<2x32xf32>, vector<32x128xf32>, vector<2x128xf32> -> vector<2x128xf32>
    %275 = arith.addf %272, %274 : vector<2x128xf32>
    %276 = arith.negf %275 : vector<2x128xf32>
    %277 = math.exp %276 : vector<2x128xf32>
    %cst_85 = arith.constant 1.000000e+00 : f32
    %278 = vector.broadcast %cst_85 : f32 to vector<2x128xf32>
    %279 = arith.addf %278, %277 : vector<2x128xf32>
    %280 = arith.divf %278, %279 : vector<2x128xf32>
    %281 = vector.extract_strided_slice %280 {offsets = [0, 0], sizes = [2, 32], strides = [1, 1]} : vector<2x128xf32> to vector<2x32xf32>
    %282 = vector.extract_strided_slice %280 {offsets = [0, 32], sizes = [2, 32], strides = [1, 1]} : vector<2x128xf32> to vector<2x32xf32>
    %283 = vector.extract_strided_slice %280 {offsets = [0, 96], sizes = [2, 32], strides = [1, 1]} : vector<2x128xf32> to vector<2x32xf32>
    %284 = vector.extract_strided_slice %275 {offsets = [0, 64], sizes = [2, 32], strides = [1, 1]} : vector<2x128xf32> to vector<2x32xf32>
    %285 = math.tanh %284 : vector<2x32xf32>
    %286 = arith.mulf %282, %268 : vector<2x32xf32>
    %287 = arith.mulf %281, %285 : vector<2x32xf32>
    %288 = arith.addf %286, %287 : vector<2x32xf32>
    %289 = math.tanh %288 : vector<2x32xf32>
    %290 = arith.mulf %283, %289 : vector<2x32xf32>
    %c4_86 = arith.constant 4 : index
    %c0_87 = arith.constant 0 : index
    %291 = vector.load %arg15[%c4_86, %c0_87] : memref<16x32xf32, #tpu.memory_space<vmem>>, vector<2x32xf32>
    tpu.vector_store %arg15[%c4_86, %c0_87], %290 {strides = array<i32>} : memref<16x32xf32, #tpu.memory_space<vmem>>, vector<2x32xf32>,
    %292 = vector.extract_strided_slice %10 {offsets = [2, 0], sizes = [2, 128], strides = [1, 1]} : vector<16x128xf32> to vector<2x128xf32>
    %c0_88 = arith.constant 0 : index
    %c0_89 = arith.constant 0 : index
    %293 = vector.load %arg5[%c0_88, %c0_89] : memref<32x128xf32, #tpu.memory_space<vmem>>, vector<32x128xf32>
    %cst_90 = arith.constant dense<0.000000e+00> : vector<2x128xf32>
    %294 = tpu.matmul %290, %293, %cst_90 {dimension_numbers = #tpu.dot_dimension_numbers<[1], [0], [0], [1], [0, 0, 1, 1], [], []>} : vector<2x32xf32>, vector<32x128xf32>, vector<2x128xf32> -> vector<2x128xf32>
    %295 = arith.addf %292, %294 : vector<2x128xf32>
    %296 = arith.negf %295 : vector<2x128xf32>
    %297 = math.exp %296 : vector<2x128xf32>
    %cst_91 = arith.constant 1.000000e+00 : f32
    %298 = vector.broadcast %cst_91 : f32 to vector<2x128xf32>
    %299 = arith.addf %298, %297 : vector<2x128xf32>
    %300 = arith.divf %298, %299 : vector<2x128xf32>
    %301 = vector.extract_strided_slice %300 {offsets = [0, 0], sizes = [2, 32], strides = [1, 1]} : vector<2x128xf32> to vector<2x32xf32>
    %302 = vector.extract_strided_slice %300 {offsets = [0, 32], sizes = [2, 32], strides = [1, 1]} : vector<2x128xf32> to vector<2x32xf32>
    %303 = vector.extract_strided_slice %300 {offsets = [0, 96], sizes = [2, 32], strides = [1, 1]} : vector<2x128xf32> to vector<2x32xf32>
    %304 = vector.extract_strided_slice %295 {offsets = [0, 64], sizes = [2, 32], strides = [1, 1]} : vector<2x128xf32> to vector<2x32xf32>
    %305 = math.tanh %304 : vector<2x32xf32>
    %306 = arith.mulf %302, %288 : vector<2x32xf32>
    %307 = arith.mulf %301, %305 : vector<2x32xf32>
    %308 = arith.addf %306, %307 : vector<2x32xf32>
    %309 = math.tanh %308 : vector<2x32xf32>
    %310 = arith.mulf %303, %309 : vector<2x32xf32>
    %c2_92 = arith.constant 2 : index
    %c0_93 = arith.constant 0 : index
    %311 = vector.load %arg15[%c2_92, %c0_93] : memref<16x32xf32, #tpu.memory_space<vmem>>, vector<2x32xf32>
    tpu.vector_store %arg15[%c2_92, %c0_93], %310 {strides = array<i32>} : memref<16x32xf32, #tpu.memory_space<vmem>>, vector<2x32xf32>,
    %312 = vector.extract_strided_slice %10 {offsets = [0, 0], sizes = [2, 128], strides = [1, 1]} : vector<16x128xf32> to vector<2x128xf32>
    %c0_94 = arith.constant 0 : index
    %c0_95 = arith.constant 0 : index
    %313 = vector.load %arg5[%c0_94, %c0_95] : memref<32x128xf32, #tpu.memory_space<vmem>>, vector<32x128xf32>
    %cst_96 = arith.constant dense<0.000000e+00> : vector<2x128xf32>
    %314 = tpu.matmul %310, %313, %cst_96 {dimension_numbers = #tpu.dot_dimension_numbers<[1], [0], [0], [1], [0, 0, 1, 1], [], []>} : vector<2x32xf32>, vector<32x128xf32>, vector<2x128xf32> -> vector<2x128xf32>
    %315 = arith.addf %312, %314 : vector<2x128xf32>
    %316 = arith.negf %315 : vector<2x128xf32>
    %317 = math.exp %316 : vector<2x128xf32>
    %cst_97 = arith.constant 1.000000e+00 : f32
    %318 = vector.broadcast %cst_97 : f32 to vector<2x128xf32>
    %319 = arith.addf %318, %317 : vector<2x128xf32>
    %320 = arith.divf %318, %319 : vector<2x128xf32>
    %321 = vector.extract_strided_slice %320 {offsets = [0, 0], sizes = [2, 32], strides = [1, 1]} : vector<2x128xf32> to vector<2x32xf32>
    %322 = vector.extract_strided_slice %320 {offsets = [0, 32], sizes = [2, 32], strides = [1, 1]} : vector<2x128xf32> to vector<2x32xf32>
    %323 = vector.extract_strided_slice %320 {offsets = [0, 96], sizes = [2, 32], strides = [1, 1]} : vector<2x128xf32> to vector<2x32xf32>
    %324 = vector.extract_strided_slice %315 {offsets = [0, 64], sizes = [2, 32], strides = [1, 1]} : vector<2x128xf32> to vector<2x32xf32>
    %325 = math.tanh %324 : vector<2x32xf32>
    %326 = arith.mulf %322, %308 : vector<2x32xf32>
    %327 = arith.mulf %321, %325 : vector<2x32xf32>
    %328 = arith.addf %326, %327 : vector<2x32xf32>
    %329 = math.tanh %328 : vector<2x32xf32>
    %330 = arith.mulf %323, %329 : vector<2x32xf32>
    %c0_98 = arith.constant 0 : index
    %c0_99 = arith.constant 0 : index
    %331 = vector.load %arg15[%c0_98, %c0_99] : memref<16x32xf32, #tpu.memory_space<vmem>>, vector<2x32xf32>
    tpu.vector_store %arg15[%c0_98, %c0_99], %330 {strides = array<i32>} : memref<16x32xf32, #tpu.memory_space<vmem>>, vector<2x32xf32>,
    %c0_100 = arith.constant 0 : index
    %c0_101 = arith.constant 0 : index
    %332 = vector.load %arg7[%c0_100, %c0_101] : memref<32x256xf32, #tpu.memory_space<vmem>>, vector<32x256xf32>
    %cst_102 = arith.constant dense<0.000000e+00> : vector<16x256xf32>
    %333 = tpu.matmul %0, %332, %cst_102 {dimension_numbers = #tpu.dot_dimension_numbers<[1], [0], [0], [1], [0, 0, 1, 1], [], []>} : vector<16x32xf32>, vector<32x256xf32>, vector<16x256xf32> -> vector<16x256xf32>
    %c0_103 = arith.constant 0 : index
    %c0_104 = arith.constant 0 : index
    %334 = vector.load %arg14[%c0_103, %c0_104] : memref<16x32xf32, #tpu.memory_space<vmem>>, vector<16x32xf32>
    %c0_105 = arith.constant 0 : index
    %c0_106 = arith.constant 0 : index
    %335 = vector.load %arg8[%c0_105, %c0_106] : memref<32x256xf32, #tpu.memory_space<vmem>>, vector<32x256xf32>
    %cst_107 = arith.constant dense<0.000000e+00> : vector<16x256xf32>
    %336 = tpu.matmul %334, %335, %cst_107 {dimension_numbers = #tpu.dot_dimension_numbers<[1], [0], [0], [1], [0, 0, 1, 1], [], []>} : vector<16x32xf32>, vector<32x256xf32>, vector<16x256xf32> -> vector<16x256xf32>
    %337 = arith.addf %333, %336 : vector<16x256xf32>
    %c0_108 = arith.constant 0 : index
    %c0_109 = arith.constant 0 : index
    %338 = vector.load %arg15[%c0_108, %c0_109] : memref<16x32xf32, #tpu.memory_space<vmem>>, vector<16x32xf32>
    %c0_110 = arith.constant 0 : index
    %c0_111 = arith.constant 0 : index
    %339 = vector.load %arg9[%c0_110, %c0_111] : memref<32x256xf32, #tpu.memory_space<vmem>>, vector<32x256xf32>
    %cst_112 = arith.constant dense<0.000000e+00> : vector<16x256xf32>
    %340 = tpu.matmul %338, %339, %cst_112 {dimension_numbers = #tpu.dot_dimension_numbers<[1], [0], [0], [1], [0, 0, 1, 1], [], []>} : vector<16x32xf32>, vector<32x256xf32>, vector<16x256xf32> -> vector<16x256xf32>
    %341 = arith.addf %337, %340 : vector<16x256xf32>
    %c0_113 = arith.constant 0 : index
    %c0_114 = arith.constant 0 : index
    %342 = vector.load %arg10[%c0_113, %c0_114] : memref<1x256xf32, #tpu.memory_space<vmem>>, vector<1x256xf32>
    %343 = vector.broadcast %342 : vector<1x256xf32> to vector<16x256xf32>
    %344 = arith.addf %341, %343 : vector<16x256xf32>
    %cst_115 = arith.constant 0.000000e+00 : f32
    %345 = vector.broadcast %cst_115 : f32 to vector<16x256xf32>
    %346 = arith.maximumf %344, %345 : vector<16x256xf32>
    %347 = vector.extract_strided_slice %346 {offsets = [0, 0], sizes = [2, 256], strides = [1, 1]} : vector<16x256xf32> to vector<2x256xf32>
    %348 = vector.extract_strided_slice %346 {offsets = [2, 0], sizes = [2, 256], strides = [1, 1]} : vector<16x256xf32> to vector<2x256xf32>
    %349 = arith.maximumf %347, %348 : vector<2x256xf32>
    %350 = vector.extract_strided_slice %346 {offsets = [4, 0], sizes = [2, 256], strides = [1, 1]} : vector<16x256xf32> to vector<2x256xf32>
    %351 = arith.maximumf %349, %350 : vector<2x256xf32>
    %352 = vector.extract_strided_slice %346 {offsets = [6, 0], sizes = [2, 256], strides = [1, 1]} : vector<16x256xf32> to vector<2x256xf32>
    %353 = arith.maximumf %351, %352 : vector<2x256xf32>
    %354 = vector.extract_strided_slice %346 {offsets = [8, 0], sizes = [2, 256], strides = [1, 1]} : vector<16x256xf32> to vector<2x256xf32>
    %355 = arith.maximumf %353, %354 : vector<2x256xf32>
    %356 = vector.extract_strided_slice %346 {offsets = [10, 0], sizes = [2, 256], strides = [1, 1]} : vector<16x256xf32> to vector<2x256xf32>
    %357 = arith.maximumf %355, %356 : vector<2x256xf32>
    %358 = vector.extract_strided_slice %346 {offsets = [12, 0], sizes = [2, 256], strides = [1, 1]} : vector<16x256xf32> to vector<2x256xf32>
    %359 = arith.maximumf %357, %358 : vector<2x256xf32>
    %360 = vector.extract_strided_slice %346 {offsets = [14, 0], sizes = [2, 256], strides = [1, 1]} : vector<16x256xf32> to vector<2x256xf32>
    %361 = arith.maximumf %359, %360 : vector<2x256xf32>
    %c0_116 = arith.constant 0 : index
    %c0_117 = arith.constant 0 : index
    %362 = vector.load %arg11[%c0_116, %c0_117] : memref<256x2xf32, #tpu.memory_space<vmem>>, vector<256x2xf32>
    %cst_118 = arith.constant dense<0.000000e+00> : vector<2x2xf32>
    %363 = tpu.matmul %361, %362, %cst_118 {dimension_numbers = #tpu.dot_dimension_numbers<[1], [0], [0], [1], [0, 0, 1, 1], [], []>} : vector<2x256xf32>, vector<256x2xf32>, vector<2x2xf32> -> vector<2x2xf32>
    %c0_119 = arith.constant 0 : index
    %c0_120 = arith.constant 0 : index
    %364 = vector.load %arg12[%c0_119, %c0_120] : memref<1x2xf32, #tpu.memory_space<vmem>>, vector<1x2xf32>
    %365 = vector.broadcast %364 : vector<1x2xf32> to vector<2x2xf32>
    %366 = arith.addf %363, %365 : vector<2x2xf32>
    %c0_121 = arith.constant 0 : index
    %c0_122 = arith.constant 0 : index
    %367 = vector.load %arg13[%c0_121, %c0_122] : memref<2x2xf32, #tpu.memory_space<vmem>>, vector<2x2xf32>
    tpu.vector_store %arg13[%c0_121, %c0_122], %366 {strides = array<i32>} : memref<2x2xf32, #tpu.memory_space<vmem>>, vector<2x2xf32>,
    return
  }
}

</mosaic_0001>

<bundles_post_ra>
// kernel: tpu_custom_call.1
= control target key start
LH: loop header
LB: loop body
LE: loop exit
PB: predicated region body
PF: predicated region fallthrough
CT: control target
= control target key end

     0   :  { %18 = vsyncpa [#allocation5], 0  ;;  %s3983_s0 = inlined_call_operand.hbm [shape: f32[16,32], index: 0, kind: input, shape index: {}]   ;;  %s3984_s1 = inlined_call_operand.vmem [shape: f32[32,128], index: 1, kind: input, shape index: {}]   ;;  %s3985_s2 = inlined_call_operand.vmem [shape: f32[32,128], index: 2, kind: input, shape index: {}]   ;;  %s3986_s3 = inlined_call_operand.vmem [shape: f32[1,128], index: 3, kind: input, shape index: {}]   ;;  %s3987_s4 = inlined_call_operand.hbm [shape: f32[32,128], index: 4, kind: input, shape index: {}]   ;;  %s3988_s5 = inlined_call_operand.hbm [shape: f32[32,128], index: 5, kind: input, shape index: {}]   ;;  %s3989_s6 = inlined_call_operand.vmem [shape: f32[1,128], index: 6, kind: input, shape index: {}]   ;;  %s3990_s7 = inlined_call_operand.vmem [shape: f32[32,256], index: 7, kind: input, shape index: {}]   ;;  %s3991_s8 = inlined_call_operand.vmem [shape: f32[32,256], index: 8, kind: input, shape index: {}]   ;;  %s3992_s9 = inlined_call_operand.vmem [shape: f32[32,256], index: 9, kind: input, shape index: {}]   ;;  %s3993_s10 = inlined_call_operand.vmem [shape: f32[1,256], index: 10, kind: input, shape index: {}]   ;;  %s3994_s11 = inlined_call_operand.vmem [shape: f32[256,2], index: 11, kind: input, shape index: {}]   ;;  %s3995_s12 = inlined_call_operand.vmem [shape: f32[1,2], index: 12, kind: input, shape index: {}]   ;;  %s3996_s13 = inlined_call_operand.hbm [shape: f32[2,2], index: 13, kind: output, shape index: {}]  }
   0x1   :  { %19 = vsyncpa [#allocation8], 0 }
   0x2   :  { %20 = vsyncpa [#allocation6], 0  ;;  %s3320_s25 = smov [#allocation7]   ;;  %s3321_s27 = smov [#allocation4]  }
   0x3   :  { %s44_s26 = sshll.u32 %s3320_s25, 4  ;;  %s26_s28 = sshll.u32 %s3321_s27, 4  ;;  %s45_s26 = int_to_ptr.vmem [resolvable:$true] %s44_s26  ;;  %s3401_s28 = int_to_ptr.vmem [resolvable:$true] %s26_s28 }
   0x4   :  { %s3226_s14 = scalar_lea.hbm %s3987_s4, 512 }
   0x5   :  { %p3227_p0 = scmp.ne.s32.totalorder %s3987_s4, %s3226_s14  ;;  %p3230_p1 = scmp.lt.u32.totalorder %s3226_s14, %s3987_s4 }
   0x7   :  { %p3232_p2 = pnand %p3230_p1, %p3227_p0 }
   0x9   :  { %3235 = shalt.err (!%p3232_p2)
}
   0xa   :  { %s3236_s19 = scalar_lea.vmem %s45_s26, 512  ;;  %p3241_p4 = scmp.lt.s32.totalorder %s45_s26, %s45_s26 }
   0xb   :  { %p3237_p3 = scmp.ne.s32.totalorder %s45_s26, %s3236_s19  ;;  %p3242_p5 = scmp.lt.s32.totalorder %s3236_s19, %s3236_s19 }
   0xd   :  { %p3243_p6 = por %p3242_p5, %p3241_p4 }
   0xf   :  { %p3244_p7 = pnand %p3243_p6, %p3237_p3 }
  0x11   :  { %3247 = shalt.err (!%p3244_p7)
}
  0x12   :  { %s3322_s20 = smov 128   ;;  %s3323_s21 = smov 8  }
  0x13   :  { %50 = dma.hbm_to_vmem [thread:$0]  %s3987_s4, 512, %s45_s26, [#allocation8], %s3322_s20, %s3322_s20, %s3323_s21  }
  0x14   :  { %s3248_s27 = scalar_lea.hbm %s3983_s0, 256 }
  0x15   :  { %p3249_p8 = scmp.ne.s32.totalorder %s3983_s0, %s3248_s27  ;;  %p3252_p9 = scmp.lt.u32.totalorder %s3248_s27, %s3983_s0 }
  0x17   :  { %p3254_p10 = pnand %p3252_p9, %p3249_p8 }
  0x19   :  { %3257 = shalt.err (!%p3254_p10)
}
  0x1a   :  { %s3258_s16 = scalar_lea.vmem %s3401_s28, 256  ;;  %p3263_p12 = scmp.lt.s32.totalorder %s3401_s28, %s3401_s28 }
  0x1b   :  { %p3259_p11 = scmp.ne.s32.totalorder %s3401_s28, %s3258_s16  ;;  %p3264_p13 = scmp.lt.s32.totalorder %s3258_s16, %s3258_s16 }
  0x1d   :  { %p3265_p0 = por %p3264_p13, %p3263_p12 }
  0x1f   :  { %p3266_p1 = pnand %p3265_p0, %p3259_p11 }
  0x21   :  { %3269 = shalt.err (!%p3266_p1)
}
  0x22   :  { %32 = dma.hbm_to_vmem [thread:$0]  %s3983_s0, 256, %s3401_s28, [#allocation5], %s3322_s20, %s3322_s20, %s3323_s21  }
  0x23   :  { %s3324_s17 = smov [#allocation9]   ;;  %s3270_s23 = scalar_lea.hbm %s3988_s5, 512 }
  0x24   :  { %s56_s18 = sshll.u32 %s3324_s17, 4  ;;  %p3271_p2 = scmp.ne.s32.totalorder %s3988_s5, %s3270_s23  ;;  %s57_s18 = int_to_ptr.vmem [resolvable:$true] %s56_s18 }
  0x25   :  { %p3274_p3 = scmp.lt.u32.totalorder %s3270_s23, %s3988_s5 }
  0x27   :  { %p3276_p4 = pnand %p3274_p3, %p3271_p2 }
  0x29   :  { %3279 = shalt.err (!%p3276_p4)
}
  0x2a   :  { %s3280_s30 = scalar_lea.vmem %s57_s18, 512  ;;  %p3285_p6 = scmp.lt.s32.totalorder %s57_s18, %s57_s18 }
  0x2b   :  { %p3281_p5 = scmp.ne.s32.totalorder %s57_s18, %s3280_s30  ;;  %p3286_p7 = scmp.lt.s32.totalorder %s3280_s30, %s3280_s30 }
  0x2d   :  { %p3287_p8 = por %p3286_p7, %p3285_p6 }
  0x2f   :  { %p3288_p9 = pnand %p3287_p8, %p3281_p5 }
  0x31   :  { %3291 = shalt.err (!%p3288_p9)
}
  0x32   :  { %62 = dma.hbm_to_vmem [thread:$0]  %s3988_s5, 512, %s57_s18, [#allocation8], %s3322_s20, %s3322_s20, %s3323_s21  }
  0x33   :  { %3314 = dma.done.wait [#allocation5], 256  }
  0x34   :  { %3315 = vsyncadd [#allocation5], 4294967040 }
  0x35   :  { %3316 = dma.done.wait [#allocation8], 1024  }
  0x36   :  { %3317 = vsyncadd [#allocation8], 4294966272  ;;  %vm99_vm0 = vcmask 261120   ;;  %v88_v0 = vld [vmem:[%s3984_s1] sm:$0xff]  ;;  %v89_v1 = vld [vmem:[%s3984_s1 + $0x8] sm:$0xff]  ;;  %v3325_v11 = vmov 0.0|0.0  }
  0x37   :  { %v90_v2 = vld [vmem:[%s3984_s1 + $0x10] sm:$0xff]  ;;  %v2909_v3 = vpack.c.bf16 %v89_v1, %v88_v0  ;;  %v91_v4 = vld [vmem:[%s3984_s1 + $0x18] sm:$0xff]  ;;  %v86_v5 = vld [vmem:[#allocation4] sm:$0xff]  ;;  %vm3326_vm1 = vmmov 0   ;;  %v3327_v15 = vmov 0.0   ;;  %s3328_s29 = smov 64  }
  0x38   :  { %v2913_v6 = vpack.c.bf16 %v91_v4, %v90_v2  ;;  %2719 = vmatprep.mubr.msk.f32.mxu0 %vm99_vm0, %v86_v5  ;;  %2730 = vmatprep.mubr.msk.f32.mxu1 %vm99_vm0, %v86_v5  ;;  %v267_v7 = vld [vmem:[%s3985_s2] sm:$0xff]  ;;  %v268_v8 = vld [vmem:[%s3985_s2 + $0x8] sm:$0xff]  ;;  %v269_v12 = vld [vmem:[%s3985_s2 + $0x10] sm:$0xff]  ;;  %vm373_vm2 = vcmask 254976   ;;  %vm486_vm3 = vcmask 257026   ;;  %vm718_vm4 = vcmask 261126  }
  0x39   :  { %2910 = vmatprep.subr.bf16.mxu0 %v2909_v3  ;;  %v87_v9 = vld [vmem:[#allocation4 + $0x8] sm:$0xff]  ;;  %v3473_v10 = vpack.c.bf16 %v268_v8, %v267_v7  ;;  %v270_v13 = vld [vmem:[%s3985_s2 + $0x18] sm:$0xff]  ;;  %v2541_v16 = vld [vmem:[%s3986_s3] ss:$0 sm:$0xff]  ;;  %s3329_s3 = smov 32   ;;  %vm602_vm5 = vcmask 259076  }
  0x3a   :  { %2912 = vmatpush3.bf16.msra.mxu0 %v2909_v3  ;;  %v3484_v14 = vpack.c.bf16 %v270_v13, %v269_v12  ;;  %v181_v34 = vld [vmem:[#allocation7] sm:$0xff]  ;;  %v182_v35 = vld [vmem:[#allocation7 + $0x8] sm:$0xff]  ;;  %v183_v36 = vld [vmem:[#allocation7 + $0x10] sm:$0xff]  ;;  %s3330_s20 = smov [#allocation10]   ;;  %vm2523_vm6 = vcmask 9216  }
  0x3b   :  { %2914 = vmatprep.subr.bf16.mxu0 %v2913_v6  ;;  %v2917_v37 = vpack.c.bf16 %v182_v35, %v181_v34  ;;  %v184_v38 = vld [vmem:[#allocation7 + $0x18] sm:$0xff]  ;;  %v3521_v43 = vld [vmem:[%s3989_s6] ss:$0 sm:$0xff]  ;;  %s2531_s21 = sshll.u32 %s3330_s20, 4  ;;  %s2532_s21 = int_to_ptr.vmem [resolvable:$true] %s2531_s21 }
  0x3c   :  { %v2921_v39 = vpack.c.bf16 %v184_v38, %v183_v36  ;;  %s3292_s18 = scalar_lea.vmem %s2532_s21, 32  ;;  %p3297_p11 = scmp.lt.s32.totalorder %s2532_s21, %s2532_s21 }
  0x3d   :  { %2918 = vmatprep.subr.bf16.mxu1 %v2917_v37  ;;  %p3293_p10 = scmp.ne.s32.totalorder %s2532_s21, %s3292_s18  ;;  %p3298_p12 = scmp.lt.s32.totalorder %s3292_s18, %s3292_s18 }
  0x3e   :  { %2916 = vmatpush3.bf16.msra.mxu0 %v2913_v6  ;;  %2920 = vmatpush3.bf16.msra.mxu1 %v2917_v37 }
  0x3f   :  { %2925 = vmatprep.subr.bf16.mxu0 %v3325_v11  ;;  %2922 = vmatprep.subr.bf16.mxu1 %v2921_v39  ;;  %p3299_p13 = por %p3298_p12, %p3297_p11 }
  0x41   :  { %2720 = vmatmul.mubr.msk.f32.vlgmr.msra.gmra.mrb[0].mxu0 %vm99_vm0, %v87_v9  ;;  %p3300_p0 = pnand %p3299_p13, %p3293_p10 }
  0x42   :  { %2927 = vmatpush3.bf16.msra.mxu0 %v3473_v10  ;;  %2741 = vmatprep.mubr.msk.f32.mxu0 %vm3326_vm1, %v3327_v15 }
  0x43   :  { %2928 = vmatprep.subr.bf16.mxu0 %v3325_v11  ;;  %2924 = vmatpush3.bf16.msra.mxu1 %v2921_v39 }
  0x44   :  { %2931 = vmatprep.subr.bf16.mxu1 %v3325_v11 }
  0x46   :  { %2930 = vmatpush3.bf16.msra.mxu0 %v3484_v14  ;;  %2731 = vmatmul.mubr.msk.f32.vlgmr.msra.gmra.mrb[0].mxu1 %vm99_vm0, %v87_v9 }
  0x47   :  { %2937 = vmatprep.subr.bf16.mxu0 %v3325_v11  ;;  %2933 = vmatpush3.bf16.msra.mxu1 %v3473_v10 }
  0x48   :  { %2752 = vmatprep.mubr.msk.f32.mxu1 %vm3326_vm1, %v3327_v15  ;;  %2934 = vmatprep.subr.bf16.mxu1 %v3325_v11 }
  0x49   :  { %2742 = vmatmul.mubr.f32.vlgmr.msra.gmra.mrb[2].mxu0 %v3327_v15 }
  0x4a   :  { %2939 = vmatpush3.bf16.msra.mxu0 %v3473_v10  ;;  %2763 = vmatprep.mubr.msk.f32.mxu0 %vm3326_vm1, %v3327_v15 }
  0x4b   :  { %2940 = vmatprep.subr.bf16.mxu0 %v3325_v11  ;;  %2936 = vmatpush3.bf16.msra.mxu1 %v3484_v14 }
  0x4c   :  { %2943 = vmatprep.subr.bf16.mxu1 %v3325_v11 }
  0x4e   :  { %2942 = vmatpush3.bf16.msra.mxu0 %v3484_v14 }
  0x4f   :  { %2949 = vmatprep.subr.bf16.mxu0 %v3325_v11 }
 0x114   :  { %v2721_v17 = vpop.f32.mrb[0].mxu0 }
 0x115   :  { %v3501_v18 = vadd.f32 %v2721_v17, %v2541_v16  ;;  %v172_v19 = vpop.f32.mrb[1].mxu0 }
 0x116   :  { %v3503_v20 = vadd.f32 %v2541_v16, %v172_v19 }
 0x119   :  { %v3523_v44 = vpop.f32.mrb[0].mxu1 }
 0x11a   :  { %v258_v45 = vpop.f32.mrb[1].mxu1 }
 0x11b   :  { %v3526_v46 = vadd.f32 %v3521_v43, %v258_v45 }
 0x11c   :  { %v340_v21 = vpop.f32.mrb[2].mxu0 }
 0x11d   :  { %v344_v22 = vadd.f32 %v340_v21, %v3503_v20  ;;  %v2743_v23 = vpop.f32.mrb[3].mxu0 }
 0x11f   :  { %3096 = vtanh.f32 %v344_v22  ;;  %v2547_v25 = vmul.f32 -1.442695, %v344_v22 }
 0x121   :  { %3098 = vpow2.f32 %v2547_v25 }
 0x129   :  { %v3097_v24 = vpop.eup %3096 }
 0x12a   :  { %354 = vrot.lane.b32.xlu0 %v3097_v24, %s3328_s29 }
 0x12b   :  { %v3099_v26 = vpop.eup %3098 }
 0x12c   :  { %v348_v27 = vadd.f32 1.0, %v3099_v26 }
 0x12e   :  { %3100 = vrcp.f32 %v348_v27 }
 0x138   :  { %v3101_v28 = vpop.eup %3100 }
 0x139   :  { %v352_v31 = vmul.f32 0.0, %v3101_v28 }
 0x19c   :  { %v355_v29 = vpop.permute.xlu0 %354 }
 0x19d   :  { %v357_v30 = vmul.f32 %v3101_v28, %v355_v29 }
 0x19f   :  { %359 = vrot.lane.b32.xlu0 %v357_v30, %s3329_s3 }
 0x211   :  { %v360_v32 = vpop.permute.xlu0 %359 }
 0x212   :  { %v362_v33 = vadd.f32 %v360_v32, %v352_v31 }
 0x214   :  { %3102 = vtanh.f32 %v362_v33  ;;  %v463_v59 = vrot.slane %v362_v33, 6 }
 0x21e   :  { %v3103_v40 = vpop.eup %3102 }
 0x21f   :  { %365 = vrot.lane.b32.xlu1 %v3103_v40, %s3328_s29 }
 0x291   :  { %v366_v41 = vpop.permute.xlu1 %365 }
 0x292   :  { %v368_v42 = vmul.f32 %v3101_v28, %v366_v41 }
 0x294   :  { %370 = vrot.lane.b32.xlu1 %v368_v42, %s3329_s3 }
 0x306   :  { %v371_v47 = vpop.permute.xlu1 %370 }
 0x307   :  { %374 = vst.msk [vmem:[#allocation2] sm:$0x3] %vm373_vm2, %v371_v47  ;;  %2753 = vmatmul.mubr.msk.f32.vlgmr.msra.gmra.mrb[2].mxu1 %vm99_vm0, %v371_v47 }
 0x308   :  { %2945 = vmatpush3.bf16.msra.mxu1 %v3473_v10  ;;  %2774 = vmatprep.mubr.msk.f32.mxu1 %vm3326_vm1, %v3327_v15 }
 0x309   :  { %2946 = vmatprep.subr.bf16.mxu1 %v3325_v11 }
 0x30c   :  { %2948 = vmatpush3.bf16.msra.mxu1 %v3484_v14 }
 0x30d   :  { %2955 = vmatprep.subr.bf16.mxu1 %v3325_v11 }
 0x3da   :  { %v447_v48 = vpop.f32.mrb[2].mxu1 }
 0x3db   :  { %v452_v49 = vrot.slane %v447_v48, 6  ;;  %v2754_v50 = vpop.f32.mrb[3].mxu1 }
 0x3dd   :  { %v454_v51 = vadd.f32 %v452_v49, %v3503_v20 }
 0x3df   :  { %3104 = vtanh.f32 %v454_v51  ;;  %v2549_v53 = vmul.f32 -1.442695, %v454_v51 }
 0x3e1   :  { %3106 = vpow2.f32 %v2549_v53 }
 0x3e9   :  { %v3105_v52 = vpop.eup %3104 }
 0x3ea   :  { %467 = vrot.lane.b32.xlu0 %v3105_v52, %s3328_s29 }
 0x3eb   :  { %v3107_v54 = vpop.eup %3106 }
 0x3ec   :  { %v458_v55 = vadd.f32 1.0, %v3107_v54 }
 0x3ee   :  { %3108 = vrcp.f32 %v458_v55 }
 0x3f8   :  { %v3109_v56 = vpop.eup %3108 }
 0x3f9   :  { %v465_v60 = vmul.f32 %v3109_v56, %v463_v59 }
 0x45c   :  { %v468_v57 = vpop.permute.xlu0 %467 }
 0x45d   :  { %v470_v58 = vmul.f32 %v3109_v56, %v468_v57 }
 0x45f   :  { %472 = vrot.lane.b32.xlu1 %v470_v58, %s3329_s3 }
 0x4d1   :  { %v473_v61 = vpop.permute.xlu1 %472 }
 0x4d2   :  { %v475_v62 = vadd.f32 %v473_v61, %v465_v60 }
 0x4d4   :  { %3110 = vtanh.f32 %v475_v62  ;;  %v579_v21 = vrot.slane %v475_v62, 6 }
 0x4de   :  { %v3111_v63 = vpop.eup %3110 }
 0x4df   :  { %478 = vrot.lane.b32.xlu0 %v3111_v63, %s3328_s29 }
 0x551   :  { %v479_v0 = vpop.permute.xlu0 %478 }
 0x552   :  { %v3540_v1 = vmul.f32 %v3109_v56, %v479_v0 }
 0x554   :  { %v492_v2 = vrot.slane %v3540_v1, 2 }
 0x556   :  { %493 = vrot.lane.b32.xlu1 %v492_v2, %s3329_s3 }
 0x5c8   :  { %v494_v3 = vpop.permute.xlu1 %493 }
 0x5c9   :  { %2764 = vmatmul.mubr.msk.f32.vlgmr.msra.gmra.mrb[4].mxu0 %vm99_vm0, %v494_v3 }
 0x5ca   :  { %2951 = vmatpush3.bf16.msra.mxu0 %v3473_v10  ;;  %2785 = vmatprep.mubr.msk.f32.mxu0 %vm3326_vm1, %v3327_v15 }
 0x5cb   :  { %2952 = vmatprep.subr.bf16.mxu0 %v3325_v11 }
 0x5ce   :  { %2954 = vmatpush3.bf16.msra.mxu0 %v3484_v14 }
 0x5cf   :  { %2961 = vmatprep.subr.bf16.mxu0 %v3325_v11 }
 0x69c   :  { %v563_v4 = vpop.f32.mrb[4].mxu0 }
 0x69d   :  { %v568_v5 = vrot.slane %v563_v4, 4  ;;  %v2765_v6 = vpop.f32.mrb[5].mxu0 }
 0x69f   :  { %v570_v7 = vadd.f32 %v568_v5, %v3503_v20 }
 0x6a1   :  { %3112 = vtanh.f32 %v570_v7  ;;  %v2551_v9 = vmul.f32 -1.442695, %v570_v7 }
 0x6a3   :  { %3114 = vpow2.f32 %v2551_v9 }
 0x6ab   :  { %v3113_v8 = vpop.eup %3112 }
 0x6ac   :  { %583 = vrot.lane.b32.xlu0 %v3113_v8, %s3328_s29 }
 0x6ad   :  { %v3115_v12 = vpop.eup %3114 }
 0x6ae   :  { %v574_v13 = vadd.f32 1.0, %v3115_v12 }
 0x6b0   :  { %3116 = vrcp.f32 %v574_v13 }
 0x6ba   :  { %v3117_v16 = vpop.eup %3116 }
 0x6bb   :  { %v581_v22 = vmul.f32 %v3117_v16, %v579_v21 }
 0x71e   :  { %v584_v17 = vpop.permute.xlu0 %583 }
 0x71f   :  { %v586_v19 = vmul.f32 %v3117_v16, %v584_v17 }
 0x721   :  { %588 = vrot.lane.b32.xlu1 %v586_v19, %s3329_s3 }
 0x793   :  { %v589_v23 = vpop.permute.xlu1 %588 }
 0x794   :  { %v591_v24 = vadd.f32 %v589_v23, %v581_v22 }
 0x796   :  { %3118 = vtanh.f32 %v591_v24  ;;  %v695_v41 = vrot.slane %v591_v24, 6 }
 0x7a0   :  { %v3119_v25 = vpop.eup %3118 }
 0x7a1   :  { %594 = vrot.lane.b32.xlu0 %v3119_v25, %s3328_s29 }
 0x813   :  { %v595_v26 = vpop.permute.xlu0 %594 }
 0x814   :  { %v3555_v27 = vmul.f32 %v3117_v16, %v595_v26 }
 0x816   :  { %v608_v28 = vrot.slane %v3555_v27, 4 }
 0x818   :  { %609 = vrot.lane.b32.xlu1 %v608_v28, %s3329_s3 }
 0x88a   :  { %v610_v29 = vpop.permute.xlu1 %609 }
 0x88b   :  { %2775 = vmatmul.mubr.msk.f32.vlgmr.msra.gmra.mrb[4].mxu1 %vm99_vm0, %v610_v29 }
 0x88c   :  { %2957 = vmatpush3.bf16.msra.mxu1 %v3473_v10  ;;  %2796 = vmatprep.mubr.msk.f32.mxu1 %vm3326_vm1, %v3327_v15 }
 0x88d   :  { %2958 = vmatprep.subr.bf16.mxu1 %v3325_v11 }
 0x890   :  { %2960 = vmatpush3.bf16.msra.mxu1 %v3484_v14 }
 0x891   :  { %2967 = vmatprep.subr.bf16.mxu1 %v3325_v11 }
 0x95e   :  { %v679_v30 = vpop.f32.mrb[4].mxu1 }
 0x95f   :  { %v684_v31 = vrot.slane %v679_v30, 2  ;;  %v2776_v32 = vpop.f32.mrb[5].mxu1 }
 0x960   :  { %v1175_v32 = vld [vmem:[#allocation9 + $0x8] sm:$0xff] }
 0x961   :  { %v686_v33 = vadd.f32 %v684_v31, %v3503_v20  ;;  %v1174_v31 = vld [vmem:[#allocation9] sm:$0xff] }
 0x963   :  { %3120 = vtanh.f32 %v686_v33  ;;  %v2553_v35 = vmul.f32 -1.442695, %v686_v33  ;;  %v3602_v33 = vpack.c.bf16 %v1175_v32, %v1174_v31 }
 0x965   :  { %3122 = vpow2.f32 %v2553_v35  ;;  %v1177_v35 = vld [vmem:[#allocation9 + $0x18] sm:$0xff] }
 0x96d   :  { %v3121_v34 = vpop.eup %3120 }
 0x96e   :  { %699 = vrot.lane.b32.xlu0 %v3121_v34, %s3328_s29  ;;  %v1176_v34 = vld [vmem:[#allocation9 + $0x10] sm:$0xff] }
 0x96f   :  { %v3123_v36 = vpop.eup %3122 }
 0x970   :  { %v690_v37 = vadd.f32 1.0, %v3123_v36 }
 0x972   :  { %3124 = vrcp.f32 %v690_v37  ;;  %v3606_v37 = vpack.c.bf16 %v1177_v35, %v1176_v34 }
 0x97c   :  { %v3125_v38 = vpop.eup %3124 }
 0x97d   :  { %v697_v42 = vmul.f32 %v3125_v38, %v695_v41 }
 0x9e0   :  { %v700_v39 = vpop.permute.xlu0 %699 }
 0x9e1   :  { %v702_v40 = vmul.f32 %v3125_v38, %v700_v39 }
 0x9e3   :  { %704 = vrot.lane.b32.xlu1 %v702_v40, %s3329_s3 }
 0xa55   :  { %v705_v45 = vpop.permute.xlu1 %704 }
 0xa56   :  { %v707_v47 = vadd.f32 %v705_v45, %v697_v42  ;;  %v3623_v45 = vadd.f32 %v3523_v44, %v3521_v43 }
 0xa58   :  { %3126 = vtanh.f32 %v707_v47  ;;  %v808_v62 = vrot.slane %v707_v47, 6 }
 0xa62   :  { %v3127_v20 = vpop.eup %3126 }
 0xa63   :  { %710 = vrot.lane.b32.xlu0 %v3127_v20, %s3328_s29 }
 0xad5   :  { %v711_v48 = vpop.permute.xlu0 %710 }
 0xad6   :  { %v3570_v49 = vmul.f32 %v3125_v38, %v711_v48 }
 0xad8   :  { %v724_v50 = vrot.slane %v3570_v49, 6 }
 0xada   :  { %725 = vrot.lane.b32.xlu1 %v724_v50, %s3329_s3 }
 0xb4c   :  { %v726_v51 = vpop.permute.xlu1 %725 }
 0xb4d   :  { %2786 = vmatmul.mubr.msk.f32.vlgmr.msra.gmra.mrb[6].mxu0 %vm99_vm0, %v726_v51 }
 0xb4e   :  { %2963 = vmatpush3.bf16.msra.mxu0 %v3473_v10  ;;  %2807 = vmatprep.mubr.msk.f32.mxu0 %vm3326_vm1, %v3327_v15 }
 0xb4f   :  { %2964 = vmatprep.subr.bf16.mxu0 %v3325_v11 }
 0xb52   :  { %2966 = vmatpush3.bf16.msra.mxu0 %v3484_v14 }
 0xb53   :  { %2973 = vmatprep.subr.bf16.mxu0 %v3325_v11 }
 0xc20   :  { %v795_v52 = vpop.f32.mrb[6].mxu0 }
 0xc21   :  { %v799_v53 = vadd.f32 %v795_v52, %v3501_v18  ;;  %v2787_v54 = vpop.f32.mrb[7].mxu0 }
 0xc23   :  { %3128 = vtanh.f32 %v799_v53  ;;  %v2555_v56 = vmul.f32 -1.442695, %v799_v53 }
 0xc25   :  { %3130 = vpow2.f32 %v2555_v56 }
 0xc2d   :  { %v3129_v55 = vpop.eup %3128 }
 0xc2e   :  { %812 = vrot.lane.b32.xlu0 %v3129_v55, %s3328_s29 }
 0xc2f   :  { %v3131_v57 = vpop.eup %3130 }
 0xc30   :  { %v803_v58 = vadd.f32 1.0, %v3131_v57 }
 0xc32   :  { %3132 = vrcp.f32 %v803_v58 }
 0xc3c   :  { %v3133_v59 = vpop.eup %3132 }
 0xc3d   :  { %v810_v63 = vmul.f32 %v3133_v59, %v808_v62 }
 0xca0   :  { %v813_v60 = vpop.permute.xlu0 %812 }
 0xca1   :  { %v815_v61 = vmul.f32 %v3133_v59, %v813_v60 }
 0xca3   :  { %817 = vrot.lane.b32.xlu1 %v815_v61, %s3329_s3 }
 0xd15   :  { %v818_v0 = vpop.permute.xlu1 %817 }
 0xd16   :  { %v820_v2 = vadd.f32 %v818_v0, %v810_v63 }
 0xd18   :  { %3134 = vtanh.f32 %v820_v2 }
 0xd22   :  { %v3135_v3 = vpop.eup %3134 }
 0xd23   :  { %823 = vrot.lane.b32.xlu0 %v3135_v3, %s3328_s29 }
 0xd95   :  { %v824_v4 = vpop.permute.xlu0 %823 }
 0xd96   :  { %v826_v5 = vmul.f32 %v3133_v59, %v824_v4 }
 0xd98   :  { %828 = vrot.lane.b32.xlu1 %v826_v5, %s3329_s3 }
 0xe0a   :  { %v829_v6 = vpop.permute.xlu1 %828 }
 0xe0b   :  { %831 = vst.msk [vmem:[#allocation2 + $0x8] sm:$0x3] %vm373_vm2, %v829_v6  ;;  %2797 = vmatmul.mubr.msk.f32.vlgmr.msra.gmra.mrb[6].mxu1 %vm99_vm0, %v829_v6 }
 0xe0c   :  { %2969 = vmatpush3.bf16.msra.mxu1 %v3473_v10  ;;  %2818 = vmatprep.mubr.msk.f32.mxu1 %vm3326_vm1, %v3327_v15 }
 0xe0d   :  { %2970 = vmatprep.subr.bf16.mxu1 %v3325_v11 }
 0xe10   :  { %2972 = vmatpush3.bf16.msra.mxu1 %v3484_v14  ;;  %v920_v14 = vrot.slane %v820_v2, 6 }
 0xe11   :  { %2979 = vmatprep.subr.bf16.mxu1 %v3325_v11 }
 0xede   :  { %v904_v7 = vpop.f32.mrb[6].mxu1 }
 0xedf   :  { %v909_v8 = vrot.slane %v904_v7, 6  ;;  %v2798_v9 = vpop.f32.mrb[7].mxu1 }
 0xee1   :  { %v911_v12 = vadd.f32 %v909_v8, %v3501_v18 }
 0xee3   :  { %3136 = vtanh.f32 %v911_v12  ;;  %v2557_v16 = vmul.f32 -1.442695, %v911_v12 }
 0xee5   :  { %3138 = vpow2.f32 %v2557_v16 }
 0xeed   :  { %v3137_v13 = vpop.eup %3136 }
 0xeee   :  { %924 = vrot.lane.b32.xlu0 %v3137_v13, %s3328_s29 }
 0xeef   :  { %v3139_v10 = vpop.eup %3138 }
 0xef0   :  { %v915_v17 = vadd.f32 1.0, %v3139_v10 }
 0xef2   :  { %3140 = vrcp.f32 %v915_v17 }
 0xefc   :  { %v3141_v19 = vpop.eup %3140 }
 0xefd   :  { %v922_v23 = vmul.f32 %v3141_v19, %v920_v14 }
 0xf60   :  { %v925_v21 = vpop.permute.xlu0 %924 }
 0xf61   :  { %v927_v22 = vmul.f32 %v3141_v19, %v925_v21 }
 0xf63   :  { %929 = vrot.lane.b32.xlu1 %v927_v22, %s3329_s3 }
 0xfd5   :  { %v930_v24 = vpop.permute.xlu1 %929 }
 0xfd6   :  { %v932_v25 = vadd.f32 %v930_v24, %v922_v23 }
 0xfd8   :  { %3142 = vtanh.f32 %v932_v25  ;;  %v1035_v62 = vrot.slane %v932_v25, 6 }
 0xfe2   :  { %v3143_v26 = vpop.eup %3142 }
 0xfe3   :  { %935 = vrot.lane.b32.xlu0 %v3143_v26, %s3328_s29 }
0x1055   :  { %v936_v28 = vpop.permute.xlu0 %935 }
0x1056   :  { %v3598_v29 = vmul.f32 %v3141_v19, %v936_v28 }
0x1058   :  { %v948_v30 = vrot.slane %v3598_v29, 2 }
0x105a   :  { %949 = vrot.lane.b32.xlu1 %v948_v30, %s3329_s3 }
0x10cc   :  { %v950_v36 = vpop.permute.xlu1 %949 }
0x10cd   :  { %2808 = vmatmul.mubr.msk.f32.vlgmr.msra.gmra.mrb[8].mxu0 %vm99_vm0, %v950_v36 }
0x10ce   :  { %2975 = vmatpush3.bf16.msra.mxu0 %v3602_v33  ;;  %2829 = vmatprep.mubr.msk.f32.mxu0 %vm3326_vm1, %v3327_v15 }
0x10cf   :  { %2976 = vmatprep.subr.bf16.mxu0 %v3325_v11 }
0x10d2   :  { %2978 = vmatpush3.bf16.msra.mxu0 %v3606_v37 }
0x10d3   :  { %2985 = vmatprep.subr.bf16.mxu0 %v3325_v11 }
0x10d5   :  { %2830 = vmatmul.mubr.f32.vlgmr.msra.gmra.mrb[10].mxu0 %v3327_v15 }
0x10d6   :  { %2987 = vmatpush3.bf16.msra.mxu0 %v3602_v33  ;;  %2851 = vmatprep.mubr.msk.f32.mxu0 %vm3326_vm1, %v3327_v15 }
0x10d7   :  { %2988 = vmatprep.subr.bf16.mxu0 %v3325_v11 }
0x10da   :  { %2990 = vmatpush3.bf16.msra.mxu0 %v3606_v37 }
0x10db   :  { %2997 = vmatprep.subr.bf16.mxu0 %v3325_v11 }
0x11a0   :  { %v1019_v38 = vpop.f32.mrb[8].mxu0 }
0x11a1   :  { %v1024_v39 = vrot.slane %v1019_v38, 4  ;;  %v2809_v40 = vpop.f32.mrb[9].mxu0 }
0x11a3   :  { %v1026_v41 = vadd.f32 %v1024_v39, %v3501_v18 }
0x11a5   :  { %3144 = vtanh.f32 %v1026_v41  ;;  %v2559_v52 = vmul.f32 -1.442695, %v1026_v41 }
0x11a8   :  { %v1244_v42 = vpop.f32.mrb[10].mxu0 }
0x11a9   :  { %v1249_v47 = vrot.slane %v1244_v42, 2  ;;  %v2831_v20 = vpop.f32.mrb[11].mxu0 }
0x11ab   :  { %v1251_v48 = vadd.f32 %v1249_v47, %v3623_v45 }
0x11ad   :  { %3146 = vtanh.f32 %v1251_v48  ;;  %v2562_v53 = vmul.f32 -1.442695, %v1251_v48 }
0x11ae   :  { %3148 = vpow2.f32 %v2559_v52 }
0x11af   :  { %v3145_v50 = vpop.eup %3144  ;;  %3150 = vpow2.f32 %v2562_v53 }
0x11b0   :  { %1039 = vrot.lane.b32.xlu0 %v3145_v50, %s3328_s29 }
0x11b7   :  { %v3147_v51 = vpop.eup %3146 }
0x11b8   :  { %1261 = vrot.lane.b32.xlu1 %v3147_v51, %s3328_s29  ;;  %v3149_v54 = vpop.eup %3148 }
0x11b9   :  { %v1030_v55 = vadd.f32 1.0, %v3149_v54  ;;  %v3151_v43 = vpop.eup %3150 }
0x11ba   :  { %v1255_v44 = vadd.f32 1.0, %v3151_v43 }
0x11bb   :  { %3152 = vrcp.f32 %v1030_v55 }
0x11bc   :  { %3154 = vrcp.f32 %v1255_v44 }
0x11c5   :  { %v3153_v56 = vpop.eup %3152 }
0x11c6   :  { %v3155_v59 = vpop.eup %3154  ;;  %v1037_v63 = vmul.f32 %v3153_v56, %v1035_v62 }
0x11c7   :  { %v1259_v3 = vmul.f32 0.0, %v3155_v59 }
0x1222   :  { %v1040_v57 = vpop.permute.xlu0 %1039 }
0x1223   :  { %v1042_v58 = vmul.f32 %v3153_v56, %v1040_v57 }
0x1225   :  { %1044 = vrot.lane.b32.xlu0 %v1042_v58, %s3329_s3 }
0x122a   :  { %v1262_v60 = vpop.permute.xlu1 %1261 }
0x122b   :  { %v1264_v61 = vmul.f32 %v3155_v59, %v1262_v60 }
0x122d   :  { %1266 = vrot.lane.b32.xlu1 %v1264_v61, %s3329_s3 }
0x1297   :  { %v1045_v0 = vpop.permute.xlu0 %1044 }
0x1298   :  { %v3630_v2 = vadd.f32 %v1045_v0, %v1037_v63 }
0x129a   :  { %3156 = vtanh.f32 %v3630_v2 }
0x129f   :  { %v1267_v4 = vpop.permute.xlu1 %1266 }
0x12a0   :  { %v1269_v5 = vadd.f32 %v1267_v4, %v1259_v3 }
0x12a2   :  { %3158 = vtanh.f32 %v1269_v5  ;;  %v1372_v36 = vrot.slane %v1269_v5, 2 }
0x12a4   :  { %v3157_v6 = vpop.eup %3156 }
0x12a5   :  { %1050 = vrot.lane.b32.xlu0 %v3157_v6, %s3328_s29 }
0x12ac   :  { %v3159_v7 = vpop.eup %3158 }
0x12ad   :  { %1272 = vrot.lane.b32.xlu1 %v3159_v7, %s3328_s29 }
0x1317   :  { %v1051_v8 = vpop.permute.xlu0 %1050 }
0x1318   :  { %v3635_v9 = vmul.f32 %v3153_v56, %v1051_v8 }
0x131a   :  { %v1063_v12 = vrot.slane %v3635_v9, 4 }
0x131c   :  { %1064 = vrot.lane.b32.xlu0 %v1063_v12, %s3329_s3 }
0x131f   :  { %v1273_v13 = vpop.permute.xlu1 %1272 }
0x1320   :  { %v3639_v16 = vmul.f32 %v3155_v59, %v1273_v13 }
0x1322   :  { %v1285_v10 = vrot.slane %v3639_v16, 6 }
0x1324   :  { %1286 = vrot.lane.b32.xlu1 %v1285_v10, %s3329_s3 }
0x138e   :  { %v1065_v17 = vpop.permute.xlu0 %1064 }
0x138f   :  { %2819 = vmatmul.mubr.msk.f32.vlgmr.msra.gmra.mrb[8].mxu1 %vm99_vm0, %v1065_v17 }
0x1390   :  { %2981 = vmatpush3.bf16.msra.mxu1 %v3602_v33  ;;  %2840 = vmatprep.mubr.msk.f32.mxu1 %vm3326_vm1, %v3327_v15 }
0x1391   :  { %2982 = vmatprep.subr.bf16.mxu1 %v3325_v11 }
0x1394   :  { %2984 = vmatpush3.bf16.msra.mxu1 %v3606_v37 }
0x1395   :  { %2991 = vmatprep.subr.bf16.mxu1 %v3325_v11 }
0x1396   :  { %v1287_v19 = vpop.permute.xlu1 %1286 }
0x1397   :  { %2841 = vmatmul.mubr.msk.f32.vlgmr.msra.gmra.mrb[10].mxu1 %vm99_vm0, %v1287_v19 }
0x1398   :  { %2993 = vmatpush3.bf16.msra.mxu1 %v3602_v33  ;;  %2862 = vmatprep.mubr.msk.f32.mxu1 %vm3326_vm1, %v3327_v15 }
0x1399   :  { %2994 = vmatprep.subr.bf16.mxu1 %v3325_v11 }
0x139c   :  { %2996 = vmatpush3.bf16.msra.mxu1 %v3606_v37 }
0x139d   :  { %3003 = vmatprep.subr.bf16.mxu1 %v3325_v11 }
0x1462   :  { %v3657_v21 = vpop.f32.mrb[8].mxu1 }
0x1463   :  { %v2820_v22 = vpop.f32.mrb[9].mxu1 }
0x146a   :  { %v1356_v14 = vpop.f32.mrb[10].mxu1 }
0x146b   :  { %v1361_v23 = vrot.slane %v1356_v14, 4  ;;  %v2842_v24 = vpop.f32.mrb[11].mxu1 }
0x146d   :  { %v1363_v25 = vadd.f32 %v1361_v23, %v3623_v45 }
0x146f   :  { %3160 = vtanh.f32 %v1363_v25  ;;  %v2564_v28 = vmul.f32 -1.442695, %v1363_v25 }
0x1471   :  { %3162 = vpow2.f32 %v2564_v28 }
0x1479   :  { %v3161_v26 = vpop.eup %3160 }
0x147a   :  { %1376 = vrot.lane.b32.xlu0 %v3161_v26, %s3328_s29 }
0x147b   :  { %v3163_v30 = vpop.eup %3162 }
0x147c   :  { %v1367_v31 = vadd.f32 1.0, %v3163_v30 }
0x147e   :  { %3164 = vrcp.f32 %v1367_v31 }
0x1488   :  { %v3165_v32 = vpop.eup %3164 }
0x1489   :  { %v1374_v38 = vmul.f32 %v3165_v32, %v1372_v36 }
0x14ec   :  { %v1377_v34 = vpop.permute.xlu0 %1376 }
0x14ed   :  { %v1379_v35 = vmul.f32 %v3165_v32, %v1377_v34 }
0x14ef   :  { %1381 = vrot.lane.b32.xlu1 %v1379_v35, %s3329_s3 }
0x1561   :  { %v1382_v39 = vpop.permute.xlu1 %1381 }
0x1562   :  { %v1384_v40 = vadd.f32 %v1382_v39, %v1374_v38 }
0x1564   :  { %3166 = vtanh.f32 %v1384_v40  ;;  %v1487_v59 = vrot.slane %v1384_v40, 2 }
0x156e   :  { %v3167_v41 = vpop.eup %3166 }
0x156f   :  { %1387 = vrot.lane.b32.xlu0 %v3167_v41, %s3328_s29 }
0x15e1   :  { %v1388_v42 = vpop.permute.xlu0 %1387 }
0x15e2   :  { %v3663_v47 = vmul.f32 %v3165_v32, %v1388_v42 }
0x15e4   :  { %v1400_v20 = vrot.slane %v3663_v47, 4 }
0x15e6   :  { %1401 = vrot.lane.b32.xlu1 %v1400_v20, %s3329_s3 }
0x1658   :  { %v1402_v48 = vpop.permute.xlu1 %1401 }
0x1659   :  { %2852 = vmatmul.mubr.msk.f32.vlgmr.msra.gmra.mrb[12].mxu0 %vm99_vm0, %v1402_v48 }
0x165a   :  { %2999 = vmatpush3.bf16.msra.mxu0 %v3602_v33  ;;  %2873 = vmatprep.mubr.msk.f32.mxu0 %vm3326_vm1, %v3327_v15 }
0x165b   :  { %3000 = vmatprep.subr.bf16.mxu0 %v3325_v11 }
0x165e   :  { %3002 = vmatpush3.bf16.msra.mxu0 %v3606_v37 }
0x165f   :  { %3009 = vmatprep.subr.bf16.mxu0 %v3325_v11 }
0x172c   :  { %v1471_v50 = vpop.f32.mrb[12].mxu0 }
0x172d   :  { %v1476_v51 = vrot.slane %v1471_v50, 6  ;;  %v2853_v52 = vpop.f32.mrb[13].mxu0 }
0x172f   :  { %v1478_v53 = vadd.f32 %v1476_v51, %v3623_v45 }
0x1731   :  { %3168 = vtanh.f32 %v1478_v53  ;;  %v2566_v55 = vmul.f32 -1.442695, %v1478_v53 }
0x1733   :  { %3170 = vpow2.f32 %v2566_v55 }
0x173b   :  { %v3169_v54 = vpop.eup %3168 }
0x173c   :  { %1491 = vrot.lane.b32.xlu0 %v3169_v54, %s3328_s29 }
0x173d   :  { %v3171_v43 = vpop.eup %3170 }
0x173e   :  { %v1482_v44 = vadd.f32 1.0, %v3171_v43 }
0x1740   :  { %3172 = vrcp.f32 %v1482_v44 }
0x174a   :  { %v3173_v56 = vpop.eup %3172 }
0x174b   :  { %v1489_v60 = vmul.f32 %v3173_v56, %v1487_v59 }
0x17ae   :  { %v1492_v57 = vpop.permute.xlu0 %1491 }
0x17af   :  { %v1494_v58 = vmul.f32 %v3173_v56, %v1492_v57 }
0x17b1   :  { %1496 = vrot.lane.b32.xlu1 %v1494_v58, %s3329_s3 }
0x1823   :  { %v1497_v61 = vpop.permute.xlu1 %1496 }
0x1824   :  { %v1499_v62 = vadd.f32 %v1497_v61, %v1489_v60 }
0x1826   :  { %3174 = vtanh.f32 %v1499_v62  ;;  %v1599_v23 = vrot.slane %v1499_v62, 2 }
0x1830   :  { %v3175_v63 = vpop.eup %3174 }
0x1831   :  { %1502 = vrot.lane.b32.xlu0 %v3175_v63, %s3328_s29 }
0x18a3   :  { %v1503_v0 = vpop.permute.xlu0 %1502 }
0x18a4   :  { %v3678_v3 = vmul.f32 %v3173_v56, %v1503_v0 }
0x18a6   :  { %v1515_v4 = vrot.slane %v3678_v3, 2 }
0x18a8   :  { %1516 = vrot.lane.b32.xlu1 %v1515_v4, %s3329_s3 }
0x191a   :  { %v1517_v5 = vpop.permute.xlu1 %1516 }
0x191b   :  { %2863 = vmatmul.mubr.msk.f32.vlgmr.msra.gmra.mrb[12].mxu1 %vm99_vm0, %v1517_v5 }
0x191c   :  { %3005 = vmatpush3.bf16.msra.mxu1 %v3602_v33  ;;  %2884 = vmatprep.mubr.msk.f32.mxu1 %vm3326_vm1, %v3327_v15 }
0x191d   :  { %3006 = vmatprep.subr.bf16.mxu1 %v3325_v11 }
0x1920   :  { %3008 = vmatpush3.bf16.msra.mxu1 %v3606_v37 }
0x1921   :  { %3015 = vmatprep.subr.bf16.mxu1 %v3325_v11 }
0x19ee   :  { %v1586_v6 = vpop.f32.mrb[12].mxu1 }
0x19ef   :  { %v1590_v7 = vadd.f32 %v1586_v6, %v3623_v45  ;;  %v2864_v8 = vpop.f32.mrb[13].mxu1 }
0x19f1   :  { %3176 = vtanh.f32 %v1590_v7  ;;  %v2568_v13 = vmul.f32 -1.442695, %v1590_v7 }
0x19f3   :  { %3178 = vpow2.f32 %v2568_v13 }
0x19fb   :  { %v3177_v12 = vpop.eup %3176 }
0x19fc   :  { %1603 = vrot.lane.b32.xlu0 %v3177_v12, %s3328_s29 }
0x19fd   :  { %v3179_v10 = vpop.eup %3178 }
0x19fe   :  { %v1594_v17 = vadd.f32 1.0, %v3179_v10 }
0x1a00   :  { %3180 = vrcp.f32 %v1594_v17 }
0x1a0a   :  { %v3181_v19 = vpop.eup %3180 }
0x1a0b   :  { %v1601_v24 = vmul.f32 %v3181_v19, %v1599_v23 }
0x1a6e   :  { %v1604_v22 = vpop.permute.xlu0 %1603 }
0x1a6f   :  { %v1606_v14 = vmul.f32 %v3181_v19, %v1604_v22 }
0x1a71   :  { %1608 = vrot.lane.b32.xlu1 %v1606_v14, %s3329_s3 }
0x1ae3   :  { %v1609_v25 = vpop.permute.xlu1 %1608 }
0x1ae4   :  { %v1611_v26 = vadd.f32 %v1609_v25, %v1601_v24 }
0x1ae6   :  { %3182 = vtanh.f32 %v1611_v26  ;;  %v1711_v50 = vrot.slane %v1611_v26, 2 }
0x1af0   :  { %v3183_v45 = vpop.eup %3182 }
0x1af1   :  { %1614 = vrot.lane.b32.xlu0 %v3183_v45, %s3328_s29 }
0x1b63   :  { %v1615_v28 = vpop.permute.xlu0 %1614 }
0x1b64   :  { %v1617_v30 = vmul.f32 %v3181_v19, %v1615_v28 }
0x1b66   :  { %1619 = vrot.lane.b32.xlu1 %v1617_v30, %s3329_s3 }
0x1bd8   :  { %v1620_v31 = vpop.permute.xlu1 %1619 }
0x1bd9   :  { %1622 = vst.msk [vmem:[#allocation3 + $0x8] sm:$0x3] %vm373_vm2, %v1620_v31  ;;  %2874 = vmatmul.mubr.msk.f32.vlgmr.msra.gmra.mrb[14].mxu0 %vm99_vm0, %v1620_v31 }
0x1bda   :  { %3011 = vmatpush3.bf16.msra.mxu0 %v3602_v33  ;;  %2895 = vmatprep.mubr.msk.f32.mxu0 %vm3326_vm1, %v3327_v15 }
0x1bdb   :  { %3012 = vmatprep.subr.bf16.mxu0 %v3325_v11 }
0x1bde   :  { %3014 = vmatpush3.bf16.msra.mxu0 %v3606_v37 }
0x1cac   :  { %v1695_v32 = vpop.f32.mrb[14].mxu0 }
0x1cad   :  { %v1700_v34 = vrot.slane %v1695_v32, 2  ;;  %v2875_v35 = vpop.f32.mrb[15].mxu0 }
0x1caf   :  { %v1702_v36 = vadd.f32 %v1700_v34, %v3526_v46  ;;  %v1139_v34 = vrot.slane %v3657_v21, 2 }
0x1cb1   :  { %3184 = vtanh.f32 %v1702_v36  ;;  %v2570_v39 = vmul.f32 -1.442695, %v1702_v36 }
0x1cb3   :  { %3186 = vpow2.f32 %v2570_v39  ;;  %v1141_v39 = vadd.f32 %v1139_v34, %v3501_v18 }
0x1cbb   :  { %v3185_v38 = vpop.eup %3184 }
0x1cbc   :  { %1715 = vrot.lane.b32.xlu0 %v3185_v38, %s3328_s29 }
0x1cbd   :  { %v3187_v40 = vpop.eup %3186 }
0x1cbe   :  { %v1706_v41 = vadd.f32 1.0, %v3187_v40 }
0x1cc0   :  { %3188 = vrcp.f32 %v1706_v41 }
0x1cca   :  { %v3189_v42 = vpop.eup %3188 }
0x1ccb   :  { %v1713_v51 = vmul.f32 %v3189_v42, %v1711_v50 }
0x1d2e   :  { %v1716_v20 = vpop.permute.xlu0 %1715 }
0x1d2f   :  { %v1718_v48 = vmul.f32 %v3189_v42, %v1716_v20 }
0x1d31   :  { %1720 = vrot.lane.b32.xlu1 %v1718_v48, %s3329_s3 }
0x1da3   :  { %v1721_v52 = vpop.permute.xlu1 %1720 }
0x1da4   :  { %v1723_v53 = vadd.f32 %v1721_v52, %v1713_v51 }
0x1da6   :  { %3190 = vtanh.f32 %v1723_v53 }
0x1db0   :  { %v3191_v54 = vpop.eup %3190 }
0x1db1   :  { %1726 = vrot.lane.b32.xlu0 %v3191_v54, %s3328_s29  ;;  %v1150_v54 = vrot.slane %v3630_v2, 6 }
0x1e23   :  { %v1727_v55 = vpop.permute.xlu0 %1726 }
0x1e24   :  { %v3705_v43 = vmul.f32 %v3189_v42, %v1727_v55  ;;  %v2561_v42 = vmul.f32 -1.442695, %v1141_v39 }
0x1e26   :  { %v1739_v44 = vrot.slane %v3705_v43, 6 }
0x1e28   :  { %1740 = vrot.lane.b32.xlu1 %v1739_v44, %s3329_s3 }
0x1e9a   :  { %v1741_v56 = vpop.permute.xlu1 %1740 }
0x1e9b   :  { %2885 = vmatmul.mubr.msk.f32.vlgmr.msra.gmra.mrb[14].mxu1 %vm99_vm0, %v1741_v56 }
0x1e9c   :  { %3017 = vmatpush3.bf16.msra.mxu1 %v3602_v33  ;;  %2906 = vmatprep.mubr.msk.f32.mxu1 %vm3326_vm1, %v3327_v15 }
0x1e9d   :  { %3018 = vmatprep.subr.bf16.mxu1 %v3325_v11  ;;  %v1826_v11 = vrot.slane %v1723_v53, 2 }
0x1ea0   :  { %3020 = vmatpush3.bf16.msra.mxu1 %v3606_v37 }
0x1f6e   :  { %v1810_v57 = vpop.f32.mrb[14].mxu1 }
0x1f6f   :  { %v1815_v58 = vrot.slane %v1810_v57, 4  ;;  %v2886_v59 = vpop.f32.mrb[15].mxu1 }
0x1f71   :  { %v1817_v60 = vadd.f32 %v1815_v58, %v3526_v46 }
0x1f73   :  { %3192 = vtanh.f32 %v1817_v60  ;;  %v2572_v62 = vmul.f32 -1.442695, %v1817_v60 }
0x1f75   :  { %3194 = vpow2.f32 %v2572_v62 }
0x1f7d   :  { %v3193_v61 = vpop.eup %3192 }
0x1f7e   :  { %1830 = vrot.lane.b32.xlu0 %v3193_v61, %s3328_s29 }
0x1f7f   :  { %v3195_v63 = vpop.eup %3194 }
0x1f80   :  { %v1821_v33 = vadd.f32 1.0, %v3195_v63 }
0x1f82   :  { %3196 = vrcp.f32 %v1821_v33 }
0x1f8c   :  { %v3197_v0 = vpop.eup %3196 }
0x1f8d   :  { %v1828_v37 = vmul.f32 %v3197_v0, %v1826_v11 }
0x1ff0   :  { %v1831_v4 = vpop.permute.xlu0 %1830 }
0x1ff1   :  { %v1833_v5 = vmul.f32 %v3197_v0, %v1831_v4 }
0x1ff3   :  { %1835 = vrot.lane.b32.xlu1 %v1833_v5, %s3329_s3 }
0x2065   :  { %v1836_v6 = vpop.permute.xlu1 %1835 }
0x2066   :  { %v1838_v7 = vadd.f32 %v1836_v6, %v1828_v37 }
0x2068   :  { %3198 = vtanh.f32 %v1838_v7  ;;  %v1941_v32 = vrot.slane %v1838_v7, 2 }
0x2072   :  { %v3199_v8 = vpop.eup %3198 }
0x2073   :  { %1841 = vrot.lane.b32.xlu0 %v3199_v8, %s3328_s29 }
0x20e5   :  { %v1842_v12 = vpop.permute.xlu0 %1841 }
0x20e6   :  { %v3719_v13 = vmul.f32 %v3197_v0, %v1842_v12  ;;  %v2088_v12 = vld [vmem:[%s3991_s8 + $0x8] sm:$0xff] }
0x20e8   :  { %v1854_v10 = vrot.slane %v3719_v13, 4 }
0x20ea   :  { %1855 = vrot.lane.b32.xlu1 %v1854_v10, %s3329_s3  ;;  %v2090_v10 = vld [vmem:[%s3991_s8 + $0x18] sm:$0xff] }
0x215c   :  { %v1856_v17 = vpop.permute.xlu1 %1855 }
0x215d   :  { %2896 = vmatmul.mubr.msk.f32.vlgmr.msra.gmra.mrb[16].mxu0 %vm99_vm0, %v1856_v17  ;;  %v3021_v17 = vpack.c.bf16 %v2090_v10, %v2088_v12 }
0x215e   :  { %2165 = vmatprep.mubr.f32.mxu0 %v3327_v15 }
0x215f   :  { %3022 = vmatprep.subr.bf16.mxu0 %v3021_v17 }
0x2230   :  { %v1925_v19 = vpop.f32.mrb[16].mxu0 }
0x2231   :  { %v1930_v22 = vrot.slane %v1925_v19, 6  ;;  %v2897_v14 = vpop.f32.mrb[17].mxu0  ;;  %v2087_v19 = vld [vmem:[%s3991_s8] sm:$0xff] }
0x2233   :  { %v1932_v23 = vadd.f32 %v1930_v22, %v3526_v46  ;;  %v2089_v22 = vld [vmem:[%s3991_s8 + $0x10] sm:$0xff] }
0x2234   :  { %v3023_v14 = vpack.c.bf16 %v2089_v22, %v2087_v19  ;;  %v2418_v22 = vld [vmem:[%s3994_s11 + $0x20] sm:$0xff] }
0x2235   :  { %3200 = vtanh.f32 %v1932_v23  ;;  %v2574_v25 = vmul.f32 -1.442695, %v1932_v23  ;;  %v2092_v23 = vld [vmem:[%s3991_s8 + $0x28] sm:$0xff] }
0x2236   :  { %3024 = vmatpush1.bf16.msra.mxu0 %v3023_v14  ;;  %v2419_v14 = vld [vmem:[%s3994_s11 + $0x28] sm:$0xff] }
0x2237   :  { %3202 = vpow2.f32 %v2574_v25 }
0x223f   :  { %v3201_v24 = vpop.eup %3200 }
0x2240   :  { %1945 = vrot.lane.b32.xlu0 %v3201_v24, %s3328_s29  ;;  %v2094_v24 = vld [vmem:[%s3991_s8 + $0x38] sm:$0xff] }
0x2241   :  { %v3203_v26 = vpop.eup %3202  ;;  %v3025_v25 = vpack.c.bf16 %v2094_v24, %v2092_v23  ;;  %v3055_v23 = vpack.c.bf16 %v2419_v14, %v2418_v22  ;;  %v2436_v24 = vld [vmem:[%s3994_s11 + $0xb0] sm:$0xff] }
0x2242   :  { %v1936_v45 = vadd.f32 1.0, %v3203_v26  ;;  %v2091_v26 = vld [vmem:[%s3991_s8 + $0x20] sm:$0xff] }
0x2243   :  { %3026 = vmatprep.subr.bf16.mxu0 %v3025_v25 }
0x2244   :  { %3204 = vrcp.f32 %v1936_v45  ;;  %v2093_v45 = vld [vmem:[%s3991_s8 + $0x30] sm:$0xff] }
0x224e   :  { %v3205_v28 = vpop.eup %3204 }
0x224f   :  { %v1943_v35 = vmul.f32 %v3205_v28, %v1941_v32  ;;  %v2080_v32 = vld [vmem:[%s3990_s7 + $0x18] sm:$0xff] }
0x22b2   :  { %v1946_v30 = vpop.permute.xlu0 %1945 }
0x22b3   :  { %v1948_v31 = vmul.f32 %v3205_v28, %v1946_v30 }
0x22b5   :  { %1950 = vrot.lane.b32.xlu1 %v1948_v31, %s3329_s3  ;;  %v2078_v31 = vld [vmem:[%s3990_s7 + $0x8] sm:$0xff] }
0x22b6   :  { %v3029_v34 = vpack.c.bf16 %v2080_v32, %v2078_v31  ;;  %v2439_v31 = vld [vmem:[%s3994_s11 + $0xc8] sm:$0xff] }
0x2327   :  { %v1951_v36 = vpop.permute.xlu1 %1950 }
0x2328   :  { %v3729_v38 = vadd.f32 %v1951_v36, %v1943_v35 }
0x232a   :  { %3206 = vtanh.f32 %v3729_v38  ;;  %v2053_v6 = vrot.slane %v3729_v38, 2  ;;  %v2430_v38 = vld [vmem:[%s3994_s11 + $0x80] sm:$0xff] }
0x232b   :  { %3208 = vtanh.f32 %v1141_v39  ;;  %v2431_v39 = vld [vmem:[%s3994_s11 + $0x88] sm:$0xff] }
0x232c   :  { %3210 = vpow2.f32 %v2561_v42  ;;  %v2433_v42 = vld [vmem:[%s3994_s11 + $0x98] sm:$0xff] }
0x2334   :  { %v3207_v40 = vpop.eup %3206 }
0x2335   :  { %1956 = vrot.lane.b32.xlu0 %v3207_v40, %s3328_s29  ;;  %v3209_v41 = vpop.eup %3208  ;;  %v3045_v40 = vpack.c.bf16 %v2431_v39, %v2430_v38  ;;  %v2441_v38 = vld [vmem:[%s3994_s11 + $0xd8] sm:$0xff] }
0x2336   :  { %v3211_v20 = vpop.eup %3210 }
0x2337   :  { %v1145_v48 = vadd.f32 1.0, %v3211_v20  ;;  %3046 = vmatprep.subr.bf16.mxu1 %v3045_v40  ;;  %v2425_v40 = vld [vmem:[%s3994_s11 + $0x58] sm:$0xff] }
0x2339   :  { %1154 = vrot.lane.b32.xlu0 %v3209_v41, %s3328_s29  ;;  %3212 = vrcp.f32 %v1145_v48  ;;  %v2432_v41 = vld [vmem:[%s3994_s11 + $0x90] sm:$0xff] }
0x2343   :  { %v3735_v52 = vpop.eup %3212 }
0x2344   :  { %v1152_v44 = vmul.f32 %v3735_v52, %v1150_v54  ;;  %v2077_v54 = vld [vmem:[%s3990_s7] sm:$0xff] }
0x23a7   :  { %v1957_v21 = vpop.permute.xlu0 %1956 }
0x23a8   :  { %v1959_v50 = vmul.f32 %v3205_v28, %v1957_v21  ;;  %v3027_v28 = vpack.c.bf16 %v2093_v45, %v2091_v26  ;;  %v3049_v21 = vpack.c.bf16 %v2433_v42, %v2432_v41  ;;  %v2420_v26 = vld [vmem:[%s3994_s11 + $0x30] sm:$0xff]  ;;  %v2421_v45 = vld [vmem:[%s3994_s11 + $0x38] sm:$0xff]  ;;  %v2442_v41 = vld [vmem:[%s3994_s11 + $0xe0] sm:$0xff] }
0x23a9   :  { %v2443_v42 = vld [vmem:[%s3994_s11 + $0xe8] sm:$0xff] }
0x23aa   :  { %v1969_v51 = vrot.slane %v1959_v50, 2  ;;  %3028 = vmatpush1.bf16.msra.mxu0 %v3027_v28  ;;  %v3059_v28 = vpack.c.bf16 %v2421_v45, %v2420_v26 }
0x23ab   :  { %v1155_v18 = vpop.permute.xlu0 %1154  ;;  %3030 = vmatprep.subr.bf16.mxu0 %v3029_v34  ;;  %v2422_v34 = vld [vmem:[%s3994_s11 + $0x40] sm:$0xff] }
0x23ac   :  { %v1157_v53 = vmul.f32 %v3735_v52, %v1155_v18  ;;  %1970 = vrot.lane.b32.xlu1 %v1969_v51, %s3329_s3  ;;  %v2417_v51 = vld [vmem:[%s3994_s11 + $0x18] sm:$0xff]  ;;  %v2435_v18 = vld [vmem:[%s3994_s11 + $0xa8] sm:$0xff] }
0x23ae   :  { %1159 = vrot.lane.b32.xlu0 %v1157_v53, %s3329_s3 }
0x241e   :  { %v1971_v55 = vpop.permute.xlu1 %1970 }
0x241f   :  { %2907 = vmatmul.mubr.msk.f32.vlgmr.msra.gmra.mrb[16].mxu1 %vm99_vm0, %v1971_v55  ;;  %v2079_v55 = vld [vmem:[%s3990_s7 + $0x10] sm:$0xff] }
0x2420   :  { %v1160_v56 = vpop.permute.xlu0 %1159 }
0x2421   :  { %v1162_v57 = vadd.f32 %v1160_v56, %v1152_v44 }
0x2423   :  { %3214 = vtanh.f32 %v1162_v57  ;;  %v2082_v57 = vld [vmem:[%s3990_s7 + $0x28] sm:$0xff] }
0x242d   :  { %v3215_v58 = vpop.eup %3214 }
0x242e   :  { %1165 = vrot.lane.b32.xlu0 %v3215_v58, %s3328_s29  ;;  %v2084_v58 = vld [vmem:[%s3990_s7 + $0x38] sm:$0xff] }
0x2432   :  { %483 = vrot.lane.b32.xlu0 %v3540_v1, %s3329_s3 }
0x2436   :  { %715 = vrot.lane.b32.xlu0 %v3570_v49, %s3329_s3 }
0x243a   :  { %1055 = vrot.lane.b32.xlu0 %v3635_v9, %s3329_s3 }
0x243e   :  { %1731 = vrot.lane.b32.xlu0 %v3705_v43, %s3329_s3 }
0x2442   :  { %1961 = vrot.lane.b32.xlu0 %v1959_v50, %s3329_s3  ;;  %v2416_v50 = vld [vmem:[%s3994_s11 + $0x10] sm:$0xff] }
0x2443   :  { %v3051_v53 = vpack.c.bf16 %v2417_v51, %v2416_v50  ;;  %v2444_v51 = vld [vmem:[%s3994_s11 + $0xf0] sm:$0xff] }
0x2446   :  { %1277 = vrot.lane.b32.xlu0 %v3639_v16, %s3329_s3 }
0x244a   :  { %1507 = vrot.lane.b32.xlu0 %v3678_v3, %s3329_s3 }
0x24a0   :  { %v1166_v2 = vpop.permute.xlu0 %1165 }
0x24a1   :  { %v1168_v35 = vmul.f32 %v3735_v52, %v1166_v2  ;;  %v2434_v52 = vld [vmem:[%s3994_s11 + $0xa0] sm:$0xff]  ;;  %v3033_v2 = vpack.c.bf16 %v2084_v58, %v2082_v57 }
0x24a2   :  { %v3053_v44 = vpack.c.bf16 %v2435_v18, %v2434_v52  ;;  %v2445_v52 = vld [vmem:[%s3994_s11 + $0xf8] sm:$0xff]  ;;  %v2428_v18 = vld [vmem:[%s3994_s11 + $0x70] sm:$0xff]  ;;  %v2352_v58 = vld [vmem:[%s3993_s10] sm:$0x3] }
0x24a4   :  { %v484_v1 = vpop.permute.xlu0 %483 }
0x24a5   :  { %487 = vst.msk [vmem:[#allocation2] sm:$0xc] %vm486_vm3, %v484_v1  ;;  %v2081_v1 = vld [vmem:[%s3990_s7 + $0x20] sm:$0xff] }
0x24a8   :  { %v716_v49 = vpop.permute.xlu0 %715 }
0x24a9   :  { %719 = vst.msk [vmem:[#allocation2] sm:$0xc0] %vm718_vm4, %v716_v49  ;;  %v2083_v49 = vld [vmem:[%s3990_s7 + $0x30] sm:$0xff] }
0x24ac   :  { %v1056_v9 = vpop.permute.xlu0 %1055 }
0x24ad   :  { %1058 = vst.msk [vmem:[#allocation2 + $0x8] sm:$0x30] %vm602_vm5, %v1056_v9 }
0x24b0   :  { %v1732_v43 = vpop.permute.xlu0 %1731 }
0x24b1   :  { %1734 = vst.msk [vmem:[#allocation3] sm:$0xc0] %vm718_vm4, %v1732_v43 }
0x24b4   :  { %v1962_v16 = vpop.permute.xlu0 %1961 }
0x24b5   :  { %1964 = vst.msk [vmem:[#allocation3] sm:$0xc] %vm486_vm3, %v1962_v16  ;;  %v2258_v16 = vld [vmem:[%s3992_s9 + $0x8] sm:$0xff] }
0x24b8   :  { %v1278_v3 = vpop.permute.xlu0 %1277 }
0x24b9   :  { %1280 = vst.msk [vmem:[#allocation3 + $0x8] sm:$0xc0] %vm718_vm4, %v1278_v3  ;;  %v2260_v3 = vld [vmem:[%s3992_s9 + $0x18] sm:$0xff] }
0x24bc   :  { %v1508_v59 = vpop.permute.xlu0 %1507 }
0x24bd   :  { %1510 = vst.msk [vmem:[#allocation3 + $0x8] sm:$0xc] %vm486_vm3, %v1508_v59  ;;  %v3035_v59 = vpack.c.bf16 %v2083_v49, %v2081_v1 }
0x24f2   :  { %v2040_v60 = vpop.f32.mrb[16].mxu1 }
0x24f3   :  { %v2044_v61 = vadd.f32 %v2040_v60, %v3526_v46  ;;  %v2908_v62 = vpop.f32.mrb[17].mxu1  ;;  %v3037_v60 = vpack.c.bf16 %v2260_v3, %v2258_v16 }
0x24f4   :  { %v2257_v62 = vld [vmem:[%s3992_s9] sm:$0xff] }
0x24f5   :  { %3216 = vtanh.f32 %v2044_v61  ;;  %v2576_v33 = vmul.f32 -1.442695, %v2044_v61 }
0x24f7   :  { %3218 = vpow2.f32 %v2576_v33 }
0x24ff   :  { %v3217_v63 = vpop.eup %3216 }
0x2500   :  { %2057 = vrot.lane.b32.xlu1 %v3217_v63, %s3328_s29  ;;  %v2259_v63 = vld [vmem:[%s3992_s9 + $0x10] sm:$0xff] }
0x2501   :  { %v3219_v0 = vpop.eup %3218 }
0x2502   :  { %v2048_v4 = vadd.f32 1.0, %v3219_v0  ;;  %v2262_v0 = vld [vmem:[%s3992_s9 + $0x28] sm:$0xff] }
0x2504   :  { %3220 = vrcp.f32 %v2048_v4  ;;  %v2264_v4 = vld [vmem:[%s3992_s9 + $0x38] sm:$0xff] }
0x250e   :  { %v3221_v5 = vpop.eup %3220 }
0x250f   :  { %v2055_v7 = vmul.f32 %v3221_v5, %v2053_v6  ;;  %v2263_v6 = vld [vmem:[%s3992_s9 + $0x30] sm:$0xff] }
0x2572   :  { %v2058_v11 = vpop.permute.xlu1 %2057 }
0x2573   :  { %v2060_v37 = vmul.f32 %v3221_v5, %v2058_v11  ;;  %v3041_v11 = vpack.c.bf16 %v2264_v4, %v2262_v0 }
0x2575   :  { %2062 = vrot.lane.b32.xlu1 %v2060_v37, %s3329_s3  ;;  %v2261_v37 = vld [vmem:[%s3992_s9 + $0x20] sm:$0xff] }
0x25e7   :  { %v2063_v8 = vpop.permute.xlu1 %2062 }
0x25e8   :  { %v2065_v46 = vadd.f32 %v2063_v8, %v2055_v7  ;;  %v3224_v7 = vld [vmem:[#allocation4] sm:$0xff]  ;;  %v3043_v8 = vpack.c.bf16 %v2263_v6, %v2261_v37 }
0x25ea   :  { %3222 = vtanh.f32 %v2065_v46  ;;  %v3225_v46 = vld [vmem:[#allocation4 + $0x8] sm:$0xff] }
0x25f4   :  { %v3223_v30 = vpop.eup %3222 }
0x25f5   :  { %2068 = vrot.lane.b32.xlu1 %v3223_v30, %s3328_s29  ;;  %v2438_v30 = vld [vmem:[%s3994_s11 + $0xc0] sm:$0xff] }
0x25f6   :  { %v3061_v32 = vpack.c.bf16 %v2439_v31, %v2438_v30 }
0x25f9   :  { %599 = vrot.lane.b32.xlu1 %v3555_v27, %s3329_s3 }
0x25fd   :  { %940 = vrot.lane.b32.xlu1 %v3598_v29, %s3329_s3  ;;  %v2414_v29 = vld [vmem:[%s3994_s11] sm:$0xff] }
0x2601   :  { %1170 = vrot.lane.b32.xlu1 %v1168_v35, %s3329_s3  ;;  %v2423_v35 = vld [vmem:[%s3994_s11 + $0x48] sm:$0xff] }
0x2605   :  { %1846 = vrot.lane.b32.xlu1 %v3719_v13, %s3329_s3  ;;  %v2415_v13 = vld [vmem:[%s3994_s11 + $0x8] sm:$0xff] }
0x2606   :  { %v3047_v48 = vpack.c.bf16 %v2415_v13, %v2414_v29  ;;  %v2424_v29 = vld [vmem:[%s3994_s11 + $0x50] sm:$0xff] }
0x2607   :  { %v3067_v13 = vpack.c.bf16 %v2425_v40, %v2424_v29 }
0x2608   :  { %3048 = vmatpush3.bf16.msra.mxu1 %v3047_v48  ;;  %v2426_v48 = vld [vmem:[%s3994_s11 + $0x60] sm:$0xff] }
0x2609   :  { %3050 = vmatprep.subr.bf16.mxu1 %v3049_v21  ;;  %v2427_v21 = vld [vmem:[%s3994_s11 + $0x68] sm:$0xff] }
0x260a   :  { %v3071_v50 = vpack.c.bf16 %v2427_v21, %v2426_v48 }
0x260c   :  { %3052 = vmatpush3.bf16.msra.mxu1 %v3051_v53  ;;  %v3073_v53 = vpack.c.bf16 %v2445_v52, %v2444_v51 }
0x260d   :  { %3054 = vmatprep.subr.bf16.mxu1 %v3053_v44  ;;  %v2354_v44 = vlaneseq }
0x2610   :  { %3056 = vmatpush3.bf16.msra.mxu1 %v3055_v23 }
0x2667   :  { %v2069_v27 = vpop.permute.xlu1 %2068 }
0x2668   :  { %v2071_v36 = vmul.f32 %v3221_v5, %v2069_v27  ;;  %v3039_v5 = vpack.c.bf16 %v2259_v63, %v2257_v62  ;;  %v3063_v27 = vpack.c.bf16 %v2423_v35, %v2422_v34 }
0x266a   :  { %2073 = vrot.lane.b32.xlu1 %v2071_v36, %s3329_s3  ;;  %v2440_v36 = vld [vmem:[%s3994_s11 + $0xd0] sm:$0xff] }
0x266b   :  { %v600_v20 = vpop.permute.xlu1 %599  ;;  %v3065_v39 = vpack.c.bf16 %v2441_v38, %v2440_v36  ;;  %v2583_v36 = vld [vmem:[%s3995_s12] ss:$0 sm:$0xff] }
0x266c   :  { %603 = vst.msk [vmem:[#allocation2] sm:$0x30] %vm602_vm5, %v600_v20  ;;  %v3069_v20 = vpack.c.bf16 %v2443_v42, %v2442_v41 }
0x266e   :  { %1392 = vrot.lane.b32.xlu1 %v3663_v47, %s3329_s3  ;;  %v3031_v47 = vpack.c.bf16 %v2079_v55, %v2077_v54  ;;  %v2429_v54 = vld [vmem:[%s3994_s11 + $0x78] sm:$0xff] }
0x266f   :  { %v941_v56 = vpop.permute.xlu1 %940  ;;  %v3075_v55 = vpack.c.bf16 %v2429_v54, %v2428_v18 }
0x2670   :  { %943 = vst.msk [vmem:[#allocation2 + $0x8] sm:$0xc] %vm486_vm3, %v941_v56  ;;  %v2355_v56 = vshrl.u32 %v2354_v44, 7 }
0x2672   :  { %v2356_v57 = vsub.s32 0, %v2355_v56 }
0x2673   :  { %v1171_v9 = vpop.permute.xlu1 %1170  ;;  %v2085_v43 = vld [vmem:[#allocation2] sm:$0xff] }
0x2674   :  { %1173 = vst.msk [vmem:[#allocation2 + $0x8] sm:$0xc0] %vm718_vm4, %v1171_v9  ;;  %2577 = vmatmul.mubr.msk.f32.vlgmr.msra.gmra.mrb[18].mxu0 %vm99_vm0, %v2085_v43 }
0x2675   :  { %2171 = vmatprep.mubr.f32.mxu0 %v3327_v15  ;;  %3032 = vmatpush1.bf16.msra.mxu0 %v3031_v47  ;;  %v2360_v47 = vsub.s32 1, %v2355_v56 }
0x2676   :  { %3034 = vmatprep.subr.bf16.mxu0 %v3033_v2  ;;  %v2357_v2 = vrot.slane %v2352_v58, %v2356_v57 }
0x2677   :  { %v1847_v61 = vpop.permute.xlu1 %1846  ;;  %v2361_v1 = vrot.slane %v2352_v58, %v2360_v47 }
0x2678   :  { %1849 = vst.msk [vmem:[#allocation3] sm:$0x30] %vm602_vm5, %v1847_v61 }
0x2679   :  { %3036 = vmatpush1.bf16.msra.mxu0 %v3035_v59 }
0x267a   :  { %3038 = vmatprep.subr.bf16.mxu0 %v3037_v60 }
0x267b   :  { %v2086_v33 = vld [vmem:[#allocation2 + $0x8] sm:$0xff] }
0x267c   :  { %2578 = vmatmul.mubr.msk.f32.gmra.mrb[20].mxu0 %vm99_vm0, %v2086_v33 }
0x267d   :  { %2242 = vmatprep.mubr.f32.mxu0 %v3327_v15 }
0x2680   :  { %2579 = vmatmul.mubr.msk.f32.vlgmr.msra.gmra.mrb[18].mxu0 %vm99_vm0, %v3224_v7 }
0x2681   :  { %3040 = vmatpush1.bf16.msra.mxu0 %v3039_v5  ;;  %2248 = vmatprep.mubr.f32.mxu0 %v3327_v15 }
0x2682   :  { %3042 = vmatprep.subr.bf16.mxu0 %v3041_v11 }
0x2684   :  { %2580 = vmatmul.mubr.msk.f32.gmra.mrb[20].mxu0 %vm99_vm0, %v3225_v46 }
0x2685   :  { %3044 = vmatpush1.bf16.msra.mxu0 %v3043_v8  ;;  %2335 = vmatprep.mubr.f32.mxu0 %v3327_v15 }
0x26dc   :  { %v2074_v12 = vpop.permute.xlu1 %2073 }
0x26dd   :  { %2076 = vst.msk [vmem:[#allocation3] sm:$0x3] %vm373_vm2, %v2074_v12 }
0x26e0   :  { %v1393_v10 = vpop.permute.xlu1 %1392 }
0x26e1   :  { %1395 = vst.msk [vmem:[#allocation3 + $0x8] sm:$0x30] %vm602_vm5, %v1393_v10 }
0x26e4   :  { %v2255_v17 = vld [vmem:[#allocation3] sm:$0xff] }
0x26e5   :  { %2581 = vmatmul.mubr.msk.f32.vlgmr.msra.gmra.mrb[18].mxu0 %vm99_vm0, %v2255_v17 }
0x26e6   :  { %2341 = vmatprep.mubr.f32.mxu0 %v3327_v15  ;;  %v2437_v15 = vld [vmem:[%s3994_s11 + $0xb8] sm:$0xff] }
0x26e7   :  { %v3057_v25 = vpack.c.bf16 %v2437_v15, %v2436_v24 }
0x26e8   :  { %v2256_v19 = vld [vmem:[#allocation3 + $0x8] sm:$0xff] }
0x26e9   :  { %2582 = vmatmul.mubr.msk.f32.gmra.mrb[20].mxu0 %vm99_vm0, %v2256_v19  ;;  %3058 = vmatprep.subr.bf16.mxu1 %v3057_v25 }
0x26ea   :  { %3060 = vmatpush3.bf16.msra.mxu1 %v3059_v28 }
0x26eb   :  { %3062 = vmatprep.subr.bf16.mxu1 %v3061_v32 }
0x26ee   :  { %3064 = vmatpush3.bf16.msra.mxu1 %v3063_v27 }
0x26ef   :  { %3066 = vmatprep.subr.bf16.mxu1 %v3065_v39 }
0x26f2   :  { %3068 = vmatpush3.bf16.msra.mxu1 %v3067_v13 }
0x26f3   :  { %3070 = vmatprep.subr.bf16.mxu1 %v3069_v20 }
0x26f6   :  { %3072 = vmatpush3.bf16.msra.mxu1 %v3071_v50 }
0x26f7   :  { %3074 = vmatprep.subr.bf16.mxu1 %v3073_v53 }
0x26fa   :  { %3076 = vmatpush3.bf16.msra.mxu1 %v3075_v55 }
0x27b8   :  { %v2337_v49 = vpop.f32.mrb[18].mxu0 }
0x27b9   :  { %v2364_v9 = vadd.f32 %v2357_v2, %v2337_v49  ;;  %v2339_v43 = vpop.f32.mrb[19].mxu0 }
0x27ba   :  { %v2365_v16 = vadd.f32 %v2361_v1, %v2339_v43 }
0x27bb   :  { %v2368_v3 = vmax.f32 %v2364_v9, 0.0 }
0x27bc   :  { %v2369_v59 = vmax.f32 %v2365_v16, 0.0  ;;  %v2343_v60 = vpop.f32.mrb[20].mxu0 }
0x27bd   :  { %v2374_v61 = vrot.slane %v2368_v3, 2  ;;  %v2366_v62 = vadd.f32 %v2357_v2, %v2343_v60  ;;  %v2345_v63 = vpop.f32.mrb[21].mxu0  ;;  %v2380_v5 = vrot.slane %v2368_v3, 4  ;;  %v2386_v7 = vrot.slane %v2368_v3, 6 }
0x27be   :  { %v2375_v33 = vrot.slane %v2369_v59, 2  ;;  %v2367_v0 = vadd.f32 %v2361_v1, %v2345_v63  ;;  %v2381_v37 = vrot.slane %v2369_v59, 4  ;;  %v2387_v12 = vrot.slane %v2369_v59, 6 }
0x27bf   :  { %v2378_v4 = vmax.f32 %v2368_v3, %v2374_v61  ;;  %v2370_v8 = vmax.f32 %v2366_v62, 0.0 }
0x27c0   :  { %v2379_v11 = vmax.f32 %v2369_v59, %v2375_v33  ;;  %v2371_v10 = vmax.f32 %v2367_v0, 0.0 }
0x27c1   :  { %v2384_v6 = vmax.f32 %v2378_v4, %v2380_v5  ;;  %v2396_v14 = vrot.slane %v2370_v8, 2  ;;  %v2402_v25 = vrot.slane %v2370_v8, 4  ;;  %v2408_v28 = vrot.slane %v2370_v8, 6 }
0x27c2   :  { %v2385_v46 = vmax.f32 %v2379_v11, %v2381_v37  ;;  %v2397_v24 = vrot.slane %v2371_v10, 2  ;;  %v2403_v45 = vrot.slane %v2371_v10, 4  ;;  %v2409_v32 = vrot.slane %v2371_v10, 6 }
0x27c3   :  { %v2390_v17 = vmax.f32 %v2384_v6, %v2386_v7 }
0x27c4   :  { %v2391_v19 = vmax.f32 %v2385_v46, %v2387_v12 }
0x27c5   :  { %v2392_v22 = vmax.f32 %v2390_v17, %v2370_v8 }
0x27c6   :  { %v2393_v23 = vmax.f32 %v2391_v19, %v2371_v10 }
0x27c7   :  { %v2400_v15 = vmax.f32 %v2392_v22, %v2396_v14 }
0x27c8   :  { %v2401_v26 = vmax.f32 %v2393_v23, %v2397_v24 }
0x27c9   :  { %v2406_v30 = vmax.f32 %v2400_v15, %v2402_v25 }
0x27ca   :  { %v2407_v31 = vmax.f32 %v2401_v26, %v2403_v45 }
0x27cb   :  { %v2412_v34 = vmax.f32 %v2406_v30, %v2408_v28 }
0x27cc   :  { %v2413_v35 = vmax.f32 %v2407_v31, %v2409_v32 }
0x27ce   :  { %2517 = vmatprep.mubr.f32.mxu1 %v2413_v35 }
0x27cf   :  { %2518 = vmatmul.mubr.f32.vlgmr.msra.gmra.mrb[18].mxu1 %v2412_v34 }
0x28a2   :  { %v2708_v27 = vpop.f32.mrb[18].mxu1 }
0x28a3   :  { %v2709_v38 = vpop.f32.mrb[19].mxu1 }
0x28a4   :  { %v2710_v39 = vadd.f32 %v2709_v38, %v2708_v27 }
0x28a6   :  { %v2520_v29 = vadd.f32 %v2710_v39, %v2583_v36 }
0x28a8   :  { %2524 = vst.msk [vmem:[#allocation10] sm:$0x3] %vm2523_vm6, %v2520_v29 }
0x28a9   :  { %3303 = shalt.err (!%p3300_p0)
}
0x28aa   :  { %s3304_s23 = scalar_lea.hbm %s3996_s13, 32 }
0x28ab   :  { %p3305_p1 = scmp.ne.s32.totalorder %s3996_s13, %s3304_s23  ;;  %p3308_p2 = scmp.lt.u32.totalorder %s3304_s23, %s3996_s13 }
0x28ad   :  { %p3310_p3 = pnand %p3308_p2, %p3305_p1 }
0x28af   :  { %3313 = shalt.err (!%p3310_p3)
}
0x28b0   :  { %2534 = dma.vmem_to_hbm [thread:$0]  %s2532_s21, 32, %s3996_s13, [#allocation6]  }
0x28b1   :  { %3318 = dma.done.wait [#allocation6], 32  }
0x28b2   :  { %3319 = vsyncadd [#allocation6], 4294967264 }
0x28b3   :  { %2538 = vsyncpa [#allocation5], 1 }
0x28b4   :  { %2539 = vsyncpa [#allocation8], 1 }
0x28b5   :  { %2540 = vsyncpa [#allocation6], 1 }

</bundles_post_ra>
